<compile_context>
chip_gen: v7x
topology: tpu7x:2x2x1
jax: 0.10.0
libtpu: 0.0.40
codegen_flags: <defaults>
</compile_context>

<pallas_src>
import functools
import math

import jax
import jax.numpy as jnp
from jax.experimental import pallas as pl
from jax.experimental.pallas import tpu as pltpu


# ----------------------------------------------------------------------------
# helpers used inside the kernel
# ----------------------------------------------------------------------------

def _ln(x, g, b, eps):
    mu = jnp.mean(x, axis=-1, keepdims=True)
    var = jnp.mean(jnp.square(x - mu), axis=-1, keepdims=True)
    return (x - mu) * jax.lax.rsqrt(var + eps) * g + b


# ----------------------------------------------------------------------------
# the fused forward kernel (grid = (n_layers,))
# ----------------------------------------------------------------------------

def _fused_forward_kernel(
        # step-invariant inputs
        emb_ref, mask_ref, embg_ref, embb_ref,
        # per-layer stacked inputs (leading layer dim selected by index_map)
        wqkv_ref, bqkv_ref, wo_ref, bo_ref,
        ln1g_ref, ln1b_ref, w1_ref, b1_ref, w2_ref, b2_ref,
        ln2g_ref, ln2b_ref,
        # classification head + loss inputs
        hw_ref, hb_ref, ow_ref, ob_ref, lab_ref, cw_ref,
        # outputs
        logits_ref, loss_ref,
        # scratch: activation slab, persistent across grid steps
        x_ref,
        *, B, L, nH, dh, eps, eps_ls):
    l = pl.program_id(0)
    last = pl.num_programs(0) - 1
    M = B * L
    H = nH * dh

    # ---- embedding LayerNorm (only on the first grid step) ------------------
    @pl.when(l == 0)
    def _():
        x_ref[...] = _ln(emb_ref[...], embg_ref[...], embb_ref[...], eps)

    x = x_ref[...]                                            # (M, H) f32

    # ---- fused Q/K/V projection (bf16 MXU operands, f32 accumulate) ---------
    qkv = (jnp.dot(x.astype(jnp.bfloat16), wqkv_ref[0],
                   preferred_element_type=jnp.float32) + bqkv_ref[0])  # (M, 3H)

    # ---- block-diagonal multi-head self-attention ----------------------------
    # Stack heads along sublanes: row index = (h*B + b)*L + i  -> (nH*M, dh).
    def gather_heads(col0):
        return jnp.concatenate(
            [qkv[:, col0 + h * dh: col0 + (h + 1) * dh] for h in range(nH)],
            axis=0)

    scale = 1.0 / math.sqrt(dh)
    q_all = gather_heads(0) * scale                           # (nH*M, dh)
    k_all = gather_heads(H)
    v_all = gather_heads(2 * H)

    # One score matmul for all (head, batch) pairs; contract last axes (no .T).
    s = jax.lax.dot_general(q_all.astype(jnp.bfloat16),
                            k_all.astype(jnp.bfloat16),
                            (((1,), (1,)), ((), ())),
                            preferred_element_type=jnp.float32)  # (nH*M, nH*M)
    # Precomputed additive mask: key padding + -1e9 on off-(head,batch) blocks,
    # applied BEFORE the row-max so cross-block probs underflow to exactly 0.
    s = s + mask_ref[...]
    s = s - jnp.max(s, axis=-1, keepdims=True)
    p = jnp.exp(s)
    p = p * pl.reciprocal(jnp.sum(p, axis=-1, keepdims=True), approx=True)

    ctx_all = jnp.dot(p.astype(jnp.bfloat16), v_all.astype(jnp.bfloat16),
                      preferred_element_type=jnp.float32)     # (nH*M, dh)
    # Re-interleave heads back onto lanes: (nH*M, dh) -> (M, H). No VMEM scratch.
    ctx = jnp.concatenate([ctx_all[h * M:(h + 1) * M, :] for h in range(nH)],
                          axis=1)

    # ---- attention output projection + residual + LayerNorm -----------------
    attn = (jnp.dot(ctx.astype(jnp.bfloat16), wo_ref[0],
                    preferred_element_type=jnp.float32) + bo_ref[0])
    h1 = _ln(attn + x, ln1g_ref[0], ln1b_ref[0], eps)

    # ---- FFN + residual + LayerNorm ------------------------------------------
    ffn = (jnp.dot(h1.astype(jnp.bfloat16), w1_ref[0],
                   preferred_element_type=jnp.float32) + b1_ref[0])
    # TODO(synk): HF RoBERTa uses exact erf-GELU; tanh approximation used here.
    ffn = jax.nn.gelu(ffn, approximate=True)
    ffn = (jnp.dot(ffn.astype(jnp.bfloat16), w2_ref[0],
                   preferred_element_type=jnp.float32) + b2_ref[0])
    x_new = _ln(ffn + h1, ln2g_ref[0], ln2b_ref[0], eps)
    x_ref[...] = x_new                                        # carry to layer l+1

    # ---- classification head + weighted label-smoothed CE (last step only) --
    @pl.when(l == last)
    def _():
        # <s>/CLS rows are b*L for each batch.
        cls = jnp.concatenate([x_new[b * L:b * L + 1, :] for b in range(B)],
                              axis=0)                          # (B, H)
        hcls = jnp.tanh(jnp.dot(cls, hw_ref[...],
                                preferred_element_type=jnp.float32)
                        + hb_ref[...])
        logits = (jnp.dot(hcls, ow_ref[...],
                          preferred_element_type=jnp.float32) + ob_ref[...])
        logits_ref[...] = logits                               # (B, C)

        Bc, C = logits.shape
        labels = lab_ref[...]                                  # (B, 1) int32
        w = cw_ref[...]                                        # (1, C)
        m = jnp.max(logits, axis=-1, keepdims=True)
        z = logits - m
        lse = jnp.log(jnp.sum(jnp.exp(z), axis=-1, keepdims=True))
        logp = z - lse                                         # (B, C)
        onehot = (jax.lax.broadcasted_iota(jnp.int32, (Bc, C), 1) == labels
                  ).astype(jnp.float32)
        w_y = jnp.sum(onehot * w, axis=-1, keepdims=True)      # (B, 1)
        denom = jnp.sum(w_y)
        nll_sum = jnp.sum(-jnp.sum(onehot * logp, axis=-1, keepdims=True) * w_y)
        smooth_sum = jnp.sum(-(logp * w))
        loss = ((1.0 - eps_ls) * nll_sum / denom
                + (eps_ls / C) * smooth_sum / denom)
        # (1,1) VMEM output; unavoidably lane-sparse at C=2 (see perf notes).
        loss_ref[...] = loss.reshape(1, 1)


# ----------------------------------------------------------------------------
# parameters (synthetic, stacked per layer for the grid-over-layers kernel)
# ----------------------------------------------------------------------------

def init_params(key, *, vocab, max_pos, hidden, n_heads, n_layers,
                intermediate, num_labels):
    std = 0.02
    keys = iter(jax.random.split(key, 16))
    H, I = hidden, intermediate

    def nrm(shape):
        return (std * jax.random.normal(next(keys), shape)).astype(jnp.float32)

    return {
        "n_heads": n_heads,
        "word_emb": nrm((vocab, H)),
        "pos_emb": nrm((max_pos, H)),
        "type_emb": nrm((1, H)),
        "emb_ln_g": jnp.ones((1, H), jnp.float32),
        "emb_ln_b": jnp.zeros((1, H), jnp.float32),
        # per-layer weights stacked on a leading layer dim; MXU operands in bf16
        "wqkv": nrm((n_layers, H, 3 * H)).astype(jnp.bfloat16),
        "bqkv": jnp.zeros((n_layers, 1, 3 * H), jnp.float32),
        "wo": nrm((n_layers, H, H)).astype(jnp.bfloat16),
        "bo": jnp.zeros((n_layers, 1, H), jnp.float32),
        "ln1_g": jnp.ones((n_layers, 1, H), jnp.float32),
        "ln1_b": jnp.zeros((n_layers, 1, H), jnp.float32),
        "w1": nrm((n_layers, H, I)).astype(jnp.bfloat16),
        "b1": jnp.zeros((n_layers, 1, I), jnp.float32),
        "w2": nrm((n_layers, I, H)).astype(jnp.bfloat16),
        "b2": jnp.zeros((n_layers, 1, H), jnp.float32),
        "ln2_g": jnp.ones((n_layers, 1, H), jnp.float32),
        "ln2_b": jnp.zeros((n_layers, 1, H), jnp.float32),
        # classification head (tiny; kept f32)
        "head_w": nrm((H, H)),
        "head_b": jnp.zeros((1, H), jnp.float32),
        "out_w": nrm((H, num_labels)),
        "out_b": jnp.zeros((1, num_labels), jnp.float32),
    }


# ----------------------------------------------------------------------------
# wrapper: embeddings + mask precompute in plain JAX, one pallas_call forward
# ----------------------------------------------------------------------------

def pallas_roberta_forward(params, input_ids, attention_mask=None, labels=None,
                           class_weights=None, label_smoothing=0.1,
                           padding_idx=1, eps=1e-5):
    B, L = input_ids.shape
    H = params["word_emb"].shape[1]
    nH = params["n_heads"]
    dh = H // nH
    nL = params["wqkv"].shape[0]
    I = params["w1"].shape[2]
    C = params["out_w"].shape[1]
    M = B * L
    N = nH * M                       # stacked (head, batch) attention rows

    if attention_mask is None:
        attention_mask = jnp.ones((B, L), jnp.int32)

    # RoBERTa position ids from input_ids != padding_idx (HF
    # create_position_ids_from_input_ids); embedding gathers stay in plain JAX.
    pos_mask = (input_ids != padding_idx).astype(jnp.int32)
    pos_ids = jnp.cumsum(pos_mask, axis=1) * pos_mask + padding_idx
    emb = (params["word_emb"][input_ids]
           + params["pos_emb"][pos_ids]
           + params["type_emb"][0]).reshape(M, H).astype(jnp.float32)

    # Precompute the full block-diagonal additive attention mask once:
    # row/col index = (h*B + b)*L + pos; 0 inside the (h,b) block on valid keys,
    # -1e9 elsewhere (cross-head / cross-batch / padded keys).
    am = attention_mask.astype(jnp.float32)
    idx = jnp.arange(N)
    blk = idx // L
    same_block = blk[:, None] == blk[None, :]
    col_valid = am[blk % B, idx % L] > 0.5
    mask_full = jnp.where(same_block & col_valid[None, :], 0.0, -1e9
                          ).astype(jnp.float32)

    if labels is None:
        lab = jnp.zeros((B, 1), jnp.int32)
        cw = jnp.ones((1, C), jnp.float32)
    else:
        lab = labels.reshape(B, 1).astype(jnp.int32)
        cw = (jnp.ones((C,), jnp.float32) if class_weights is None
              else class_weights).reshape(1, C).astype(jnp.float32)

    kernel = functools.partial(_fused_forward_kernel, B=B, L=L, nH=nH, dh=dh,
                               eps=eps, eps_ls=label_smoothing)

    const2 = lambda l: (0, 0)
    layer3 = lambda l: (l, 0, 0)

    in_specs = [
        pl.BlockSpec((M, H), const2),            # emb (pre-LN)
        pl.BlockSpec((N, N), const2),            # block-diagonal attention mask
        pl.BlockSpec((1, H), const2),            # emb_ln_g
        pl.BlockSpec((1, H), const2),            # emb_ln_b
        pl.BlockSpec((1, H, 3 * H), layer3),     # wqkv (bf16)
        pl.BlockSpec((1, 1, 3 * H), layer3),     # bqkv
        pl.BlockSpec((1, H, H), layer3),         # wo (bf16)
        pl.BlockSpec((1, 1, H), layer3),         # bo
        pl.BlockSpec((1, 1, H), layer3),         # ln1_g
        pl.BlockSpec((1, 1, H), layer3),         # ln1_b
        pl.BlockSpec((1, H, I), layer3),         # w1 (bf16)
        pl.BlockSpec((1, 1, I), layer3),         # b1
        pl.BlockSpec((1, I, H), layer3),         # w2 (bf16)
        pl.BlockSpec((1, 1, H), layer3),         # b2
        pl.BlockSpec((1, 1, H), layer3),         # ln2_g
        pl.BlockSpec((1, 1, H), layer3),         # ln2_b
        pl.BlockSpec((H, H), const2),            # head_w
        pl.BlockSpec((1, H), const2),            # head_b
        pl.BlockSpec((H, C), const2),            # out_w
        pl.BlockSpec((1, C), const2),            # out_b
        pl.BlockSpec((B, 1), const2),            # labels
        pl.BlockSpec((1, C), const2),            # class weights
    ]
    out_specs = (pl.BlockSpec((B, C), const2),   # logits
                 pl.BlockSpec((1, 1), const2))   # loss

    logits, loss = pl.pallas_call(
        kernel,
        out_shape=(jax.ShapeDtypeStruct((B, C), jnp.float32),
                   jax.ShapeDtypeStruct((1, 1), jnp.float32)),
        grid_spec=pltpu.PrefetchScalarGridSpec(
            num_scalar_prefetch=0,
            grid=(nL,),                          # layers: sequential carry in x
            in_specs=in_specs,
            out_specs=out_specs,
            scratch_shapes=[pltpu.VMEM((M, H), jnp.float32)]),
        compiler_params=pltpu.CompilerParams(
            dimension_semantics=("arbitrary",)),
    )(emb, mask_full,
      params["emb_ln_g"], params["emb_ln_b"],
      params["wqkv"], params["bqkv"], params["wo"], params["bo"],
      params["ln1_g"], params["ln1_b"],
      params["w1"], params["b1"], params["w2"], params["b2"],
      params["ln2_g"], params["ln2_b"],
      params["head_w"], params["head_b"], params["out_w"], params["out_b"],
      lab, cw)

    if labels is None:
        return {"logits": logits}
    return {"loss": loss[0, 0], "logits": logits}


# ----------------------------------------------------------------------------
# main
# ----------------------------------------------------------------------------

if __name__ == "__main__":
    B, L = 2, 8
    H, nH, n_layers, I, V, num_labels = 32, 4, 2, 128, 64, 2

    key = jax.random.PRNGKey(0)
    k_param, k_ids = jax.random.split(key)

    params = init_params(k_param, vocab=V, max_pos=L + 4, hidden=H,
                         n_heads=nH, n_layers=n_layers, intermediate=I,
                         num_labels=num_labels)

    input_ids = jax.random.randint(k_ids, (B, L), 3, V, dtype=jnp.int32)
    attention_mask = jnp.ones((B, L), dtype=jnp.int32).at[1, L - 2:].set(0)
    # keep the padded positions consistent with RoBERTa's pad token id (=1)
    input_ids = jnp.where(attention_mask == 1, input_ids, 1)
    labels = jnp.array([0, 1], dtype=jnp.int32)
    class_weights = jnp.array([2.0, 1.0], dtype=jnp.float32)

    out = pallas_roberta_forward(params, input_ids, attention_mask,
                                 labels=labels, class_weights=class_weights,
                                 label_smoothing=0.1)
    jax.block_until_ready(out["loss"])
    jax.block_until_ready(out["logits"])
    assert out["logits"].shape == (B, num_labels)
    assert out["loss"].shape == ()
    assert bool(jnp.isfinite(out["loss"]))

    # no-labels path (logits only), mirroring the reference forward
    out2 = pallas_roberta_forward(params, input_ids, attention_mask)
    jax.block_until_ready(out2["logits"])
    assert out2["logits"].shape == (B, num_labels)

    print("KERNEL_OK")
</pallas_src>

<mosaic_0001>
module attributes {stable_mosaic.version = 11 : i64} {
  func.func @_fused_forward_kernel(%arg0: i32, %arg1: memref<16x32xf32, #tpu.memory_space<vmem>>, %arg2: memref<64x64xf32, #tpu.memory_space<vmem>>, %arg3: memref<1x32xf32, #tpu.memory_space<vmem>>, %arg4: memref<1x32xf32, #tpu.memory_space<vmem>>, %arg5: memref<1x32x96xbf16, #tpu.memory_space<vmem>>, %arg6: memref<1x1x96xf32, #tpu.memory_space<vmem>>, %arg7: memref<1x32x32xbf16, #tpu.memory_space<vmem>>, %arg8: memref<1x1x32xf32, #tpu.memory_space<vmem>>, %arg9: memref<1x1x32xf32, #tpu.memory_space<vmem>>, %arg10: memref<1x1x32xf32, #tpu.memory_space<vmem>>, %arg11: memref<1x32x128xbf16, #tpu.memory_space<vmem>>, %arg12: memref<1x1x128xf32, #tpu.memory_space<vmem>>, %arg13: memref<1x128x32xbf16, #tpu.memory_space<vmem>>, %arg14: memref<1x1x32xf32, #tpu.memory_space<vmem>>, %arg15: memref<1x1x32xf32, #tpu.memory_space<vmem>>, %arg16: memref<1x1x32xf32, #tpu.memory_space<vmem>>, %arg17: memref<32x32xf32, #tpu.memory_space<vmem>>, %arg18: memref<1x32xf32, #tpu.memory_space<vmem>>, %arg19: memref<32x2xf32, #tpu.memory_space<vmem>>, %arg20: memref<1x2xf32, #tpu.memory_space<vmem>>, %arg21: memref<2x1xi32, #tpu.memory_space<vmem>>, %arg22: memref<1x2xf32, #tpu.memory_space<vmem>>, %arg23: memref<2x2xf32, #tpu.memory_space<vmem>>, %arg24: memref<1x1xf32, #tpu.memory_space<vmem>>, %arg25: memref<16x32xf32, #tpu.memory_space<vmem>>) attributes {dimension_semantics = [#tpu.dimension_semantics<arbitrary>], iteration_bounds = array<i64: 2>, scalar_prefetch = 0 : i64, scratch_operands = 1 : i64, tpu.core_type = #tpu.core_type<tc>, window_params = [{pipeline_mode = #tpu.pipeline_mode<synchronous>, transform_indices = @transform_0, window_bounds = array<i64: 16, 32>}, {pipeline_mode = #tpu.pipeline_mode<synchronous>, transform_indices = @transform_1, window_bounds = array<i64: 64, 64>}, {pipeline_mode = #tpu.pipeline_mode<synchronous>, transform_indices = @transform_2, window_bounds = array<i64: 1, 32>}, {pipeline_mode = #tpu.pipeline_mode<synchronous>, transform_indices = @transform_3, window_bounds = array<i64: 1, 32>}, {transform_indices = @transform_4, window_bounds = array<i64: 1, 32, 96>}, {transform_indices = @transform_5, window_bounds = array<i64: 1, 1, 96>}, {transform_indices = @transform_6, window_bounds = array<i64: 1, 32, 32>}, {transform_indices = @transform_7, window_bounds = array<i64: 1, 1, 32>}, {transform_indices = @transform_8, window_bounds = array<i64: 1, 1, 32>}, {transform_indices = @transform_9, window_bounds = array<i64: 1, 1, 32>}, {transform_indices = @transform_10, window_bounds = array<i64: 1, 32, 128>}, {transform_indices = @transform_11, window_bounds = array<i64: 1, 1, 128>}, {transform_indices = @transform_12, window_bounds = array<i64: 1, 128, 32>}, {transform_indices = @transform_13, window_bounds = array<i64: 1, 1, 32>}, {transform_indices = @transform_14, window_bounds = array<i64: 1, 1, 32>}, {transform_indices = @transform_15, window_bounds = array<i64: 1, 1, 32>}, {pipeline_mode = #tpu.pipeline_mode<synchronous>, transform_indices = @transform_16, window_bounds = array<i64: 32, 32>}, {pipeline_mode = #tpu.pipeline_mode<synchronous>, transform_indices = @transform_17, window_bounds = array<i64: 1, 32>}, {pipeline_mode = #tpu.pipeline_mode<synchronous>, transform_indices = @transform_18, window_bounds = array<i64: 32, 2>}, {pipeline_mode = #tpu.pipeline_mode<synchronous>, transform_indices = @transform_19, window_bounds = array<i64: 1, 2>}, {pipeline_mode = #tpu.pipeline_mode<synchronous>, transform_indices = @transform_20, window_bounds = array<i64: 2, 1>}, {pipeline_mode = #tpu.pipeline_mode<synchronous>, transform_indices = @transform_21, window_bounds = array<i64: 1, 2>}, {pipeline_mode = #tpu.pipeline_mode<synchronous>, transform_indices = @transform_22, window_bounds = array<i64: 2, 2>}, {pipeline_mode = #tpu.pipeline_mode<synchronous>, transform_indices = @transform_23, window_bounds = array<i64: 1, 1>}]} {
    %c0_i32 = arith.constant 0 : i32
    %0 = arith.cmpi eq, %arg0, %c0_i32 : i32
    %1 = arith.extui %0 : i1 to i32
    %c0_i32_0 = arith.constant 0 : i32
    %2 = arith.cmpi ne, %1, %c0_i32_0 : i32
    scf.if %2 {
      %c0_65 = arith.constant 0 : index
      %c0_66 = arith.constant 0 : index
      %147 = vector.load %arg1[%c0_65, %c0_66] : memref<16x32xf32, #tpu.memory_space<vmem>>, vector<16x32xf32>
      %c0_67 = arith.constant 0 : index
      %c0_68 = arith.constant 0 : index
      %148 = vector.load %arg3[%c0_67, %c0_68] : memref<1x32xf32, #tpu.memory_space<vmem>>, vector<1x32xf32>
      %c0_69 = arith.constant 0 : index
      %c0_70 = arith.constant 0 : index
      %149 = vector.load %arg4[%c0_69, %c0_70] : memref<1x32xf32, #tpu.memory_space<vmem>>, vector<1x32xf32>
      %cst_71 = arith.constant dense<0.000000e+00> : vector<16xf32>
      %150 = vector.multi_reduction <add>, %147, %cst_71 [1] : vector<16x32xf32> to vector<16xf32>
      %151 = vector.shape_cast %150 : vector<16xf32> to vector<16x1xf32>
      %cst_72 = arith.constant 3.200000e+01 : f32
      %152 = vector.broadcast %cst_72 : f32 to vector<16x1xf32>
      %153 = arith.divf %151, %152 : vector<16x1xf32>
      %154 = vector.broadcast %153 : vector<16x1xf32> to vector<16x32xf32>
      %155 = arith.subf %147, %154 : vector<16x32xf32>
      %156 = arith.mulf %155, %155 : vector<16x32xf32>
      %cst_73 = arith.constant dense<0.000000e+00> : vector<16xf32>
      %157 = vector.multi_reduction <add>, %156, %cst_73 [1] : vector<16x32xf32> to vector<16xf32>
      %158 = vector.shape_cast %157 : vector<16xf32> to vector<16x1xf32>
      %cst_74 = arith.constant 3.200000e+01 : f32
      %159 = vector.broadcast %cst_74 : f32 to vector<16x1xf32>
      %160 = arith.divf %158, %159 : vector<16x1xf32>
      %161 = vector.broadcast %153 : vector<16x1xf32> to vector<16x32xf32>
      %162 = arith.subf %147, %161 : vector<16x32xf32>
      %cst_75 = arith.constant 9.99999974E-6 : f32
      %163 = vector.broadcast %cst_75 : f32 to vector<16x1xf32>
      %164 = arith.addf %160, %163 : vector<16x1xf32>
      %165 = math.rsqrt %164 : vector<16x1xf32>
      %166 = vector.broadcast %165 : vector<16x1xf32> to vector<16x32xf32>
      %167 = arith.mulf %162, %166 : vector<16x32xf32>
      %168 = vector.broadcast %148 : vector<1x32xf32> to vector<16x32xf32>
      %169 = arith.mulf %167, %168 : vector<16x32xf32>
      %170 = vector.broadcast %149 : vector<1x32xf32> to vector<16x32xf32>
      %171 = arith.addf %169, %170 : vector<16x32xf32>
      %c0_76 = arith.constant 0 : index
      %c0_77 = arith.constant 0 : index
      %172 = vector.load %arg25[%c0_76, %c0_77] : memref<16x32xf32, #tpu.memory_space<vmem>>, vector<16x32xf32>
      tpu.vector_store %arg25[%c0_76, %c0_77], %171 {strides = array<i32>} : memref<16x32xf32, #tpu.memory_space<vmem>>, vector<16x32xf32>,
    } else {
    }
    %c0 = arith.constant 0 : index
    %c0_1 = arith.constant 0 : index
    %3 = vector.load %arg25[%c0, %c0_1] : memref<16x32xf32, #tpu.memory_space<vmem>>, vector<16x32xf32>
    %4 = arith.truncf %3 : vector<16x32xf32> to vector<16x32xbf16>
    %c0_2 = arith.constant 0 : index
    %c0_3 = arith.constant 0 : index
    %c0_4 = arith.constant 0 : index
    %5 = vector.load %arg5[%c0_2, %c0_3, %c0_4] : memref<1x32x96xbf16, #tpu.memory_space<vmem>>, vector<1x32x96xbf16>
    %6 = vector.shape_cast %5 : vector<1x32x96xbf16> to vector<32x96xbf16>
    %cst = arith.constant dense<0.000000e+00> : vector<16x96xf32>
    %7 = tpu.matmul %4, %6, %cst {dimension_numbers = #tpu.dot_dimension_numbers<[1], [0], [0], [1], [0, 0, 1, 1], [], []>} : vector<16x32xbf16>, vector<32x96xbf16>, vector<16x96xf32> -> vector<16x96xf32>
    %c0_5 = arith.constant 0 : index
    %c0_6 = arith.constant 0 : index
    %c0_7 = arith.constant 0 : index
    %8 = vector.load %arg6[%c0_5, %c0_6, %c0_7] : memref<1x1x96xf32, #tpu.memory_space<vmem>>, vector<1x1x96xf32>
    %9 = vector.shape_cast %8 : vector<1x1x96xf32> to vector<1x96xf32>
    %10 = vector.broadcast %9 : vector<1x96xf32> to vector<16x96xf32>
    %11 = arith.addf %7, %10 : vector<16x96xf32>
    %12 = vector.extract_strided_slice %11 {offsets = [0, 0], sizes = [16, 8], strides = [1, 1]} : vector<16x96xf32> to vector<16x8xf32>
    %13 = vector.extract_strided_slice %11 {offsets = [0, 8], sizes = [16, 8], strides = [1, 1]} : vector<16x96xf32> to vector<16x8xf32>
    %14 = vector.extract_strided_slice %11 {offsets = [0, 16], sizes = [16, 8], strides = [1, 1]} : vector<16x96xf32> to vector<16x8xf32>
    %15 = vector.extract_strided_slice %11 {offsets = [0, 24], sizes = [16, 8], strides = [1, 1]} : vector<16x96xf32> to vector<16x8xf32>
    %16 = tpu.concatenate %12, %13, %14, %15 in 0 : vector<16x8xf32>, vector<16x8xf32>, vector<16x8xf32>, vector<16x8xf32> -> vector<64x8xf32>
    %cst_8 = arith.constant 0.353553385 : f32
    %17 = vector.broadcast %cst_8 : f32 to vector<64x8xf32>
    %18 = arith.mulf %16, %17 : vector<64x8xf32>
    %19 = vector.extract_strided_slice %11 {offsets = [0, 32], sizes = [16, 8], strides = [1, 1]} : vector<16x96xf32> to vector<16x8xf32>
    %20 = vector.extract_strided_slice %11 {offsets = [0, 40], sizes = [16, 8], strides = [1, 1]} : vector<16x96xf32> to vector<16x8xf32>
    %21 = vector.extract_strided_slice %11 {offsets = [0, 48], sizes = [16, 8], strides = [1, 1]} : vector<16x96xf32> to vector<16x8xf32>
    %22 = vector.extract_strided_slice %11 {offsets = [0, 56], sizes = [16, 8], strides = [1, 1]} : vector<16x96xf32> to vector<16x8xf32>
    %23 = tpu.concatenate %19, %20, %21, %22 in 0 : vector<16x8xf32>, vector<16x8xf32>, vector<16x8xf32>, vector<16x8xf32> -> vector<64x8xf32>
    %24 = vector.extract_strided_slice %11 {offsets = [0, 64], sizes = [16, 8], strides = [1, 1]} : vector<16x96xf32> to vector<16x8xf32>
    %25 = vector.extract_strided_slice %11 {offsets = [0, 72], sizes = [16, 8], strides = [1, 1]} : vector<16x96xf32> to vector<16x8xf32>
    %26 = vector.extract_strided_slice %11 {offsets = [0, 80], sizes = [16, 8], strides = [1, 1]} : vector<16x96xf32> to vector<16x8xf32>
    %27 = vector.extract_strided_slice %11 {offsets = [0, 88], sizes = [16, 8], strides = [1, 1]} : vector<16x96xf32> to vector<16x8xf32>
    %28 = tpu.concatenate %24, %25, %26, %27 in 0 : vector<16x8xf32>, vector<16x8xf32>, vector<16x8xf32>, vector<16x8xf32> -> vector<64x8xf32>
    %29 = arith.truncf %18 : vector<64x8xf32> to vector<64x8xbf16>
    %30 = arith.truncf %23 : vector<64x8xf32> to vector<64x8xbf16>
    %cst_9 = arith.constant dense<0.000000e+00> : vector<64x64xf32>
    %31 = tpu.matmul %29, %30, %cst_9 {dimension_numbers = #tpu.dot_dimension_numbers<[1], [1], [0], [0], [0, 0, 1, 0], [], []>} : vector<64x8xbf16>, vector<64x8xbf16>, vector<64x64xf32> -> vector<64x64xf32>
    %c0_10 = arith.constant 0 : index
    %c0_11 = arith.constant 0 : index
    %32 = vector.load %arg2[%c0_10, %c0_11] : memref<64x64xf32, #tpu.memory_space<vmem>>, vector<64x64xf32>
    %33 = arith.addf %31, %32 : vector<64x64xf32>
    %cst_12 = arith.constant dense<0xFF800000> : vector<64xf32>
    %34 = vector.multi_reduction <maximumf>, %33, %cst_12 [1] : vector<64x64xf32> to vector<64xf32>
    %35 = vector.shape_cast %34 : vector<64xf32> to vector<64x1xf32>
    %36 = vector.broadcast %35 : vector<64x1xf32> to vector<64x64xf32>
    %37 = arith.subf %33, %36 : vector<64x64xf32>
    %38 = math.exp %37 : vector<64x64xf32>
    %cst_13 = arith.constant dense<0.000000e+00> : vector<64xf32>
    %39 = vector.multi_reduction <add>, %38, %cst_13 [1] : vector<64x64xf32> to vector<64xf32>
    %40 = vector.shape_cast %39 : vector<64xf32> to vector<64x1xf32>
    %41 = tpu.reciprocal %40 {approx = true} : vector<64x1xf32> -> vector<64x1xf32>
    %42 = vector.broadcast %41 : vector<64x1xf32> to vector<64x64xf32>
    %43 = arith.mulf %38, %42 : vector<64x64xf32>
    %44 = arith.truncf %43 : vector<64x64xf32> to vector<64x64xbf16>
    %45 = arith.truncf %28 : vector<64x8xf32> to vector<64x8xbf16>
    %cst_14 = arith.constant dense<0.000000e+00> : vector<64x8xf32>
    %46 = tpu.matmul %44, %45, %cst_14 {dimension_numbers = #tpu.dot_dimension_numbers<[1], [0], [0], [1], [0, 0, 1, 1], [], []>} : vector<64x64xbf16>, vector<64x8xbf16>, vector<64x8xf32> -> vector<64x8xf32>
    %47 = vector.extract_strided_slice %46 {offsets = [0, 0], sizes = [16, 8], strides = [1, 1]} : vector<64x8xf32> to vector<16x8xf32>
    %48 = vector.extract_strided_slice %46 {offsets = [16, 0], sizes = [16, 8], strides = [1, 1]} : vector<64x8xf32> to vector<16x8xf32>
    %49 = vector.extract_strided_slice %46 {offsets = [32, 0], sizes = [16, 8], strides = [1, 1]} : vector<64x8xf32> to vector<16x8xf32>
    %50 = vector.extract_strided_slice %46 {offsets = [48, 0], sizes = [16, 8], strides = [1, 1]} : vector<64x8xf32> to vector<16x8xf32>
    %51 = tpu.concatenate %47, %48, %49, %50 in 1 : vector<16x8xf32>, vector<16x8xf32>, vector<16x8xf32>, vector<16x8xf32> -> vector<16x32xf32>
    %52 = arith.truncf %51 : vector<16x32xf32> to vector<16x32xbf16>
    %c0_15 = arith.constant 0 : index
    %c0_16 = arith.constant 0 : index
    %c0_17 = arith.constant 0 : index
    %53 = vector.load %arg7[%c0_15, %c0_16, %c0_17] : memref<1x32x32xbf16, #tpu.memory_space<vmem>>, vector<1x32x32xbf16>
    %54 = vector.shape_cast %53 : vector<1x32x32xbf16> to vector<32x32xbf16>
    %cst_18 = arith.constant dense<0.000000e+00> : vector<16x32xf32>
    %55 = tpu.matmul %52, %54, %cst_18 {dimension_numbers = #tpu.dot_dimension_numbers<[1], [0], [0], [1], [0, 0, 1, 1], [], []>} : vector<16x32xbf16>, vector<32x32xbf16>, vector<16x32xf32> -> vector<16x32xf32>
    %c0_19 = arith.constant 0 : index
    %c0_20 = arith.constant 0 : index
    %c0_21 = arith.constant 0 : index
    %56 = vector.load %arg8[%c0_19, %c0_20, %c0_21] : memref<1x1x32xf32, #tpu.memory_space<vmem>>, vector<1x1x32xf32>
    %57 = vector.shape_cast %56 : vector<1x1x32xf32> to vector<1x32xf32>
    %58 = vector.broadcast %57 : vector<1x32xf32> to vector<16x32xf32>
    %59 = arith.addf %55, %58 : vector<16x32xf32>
    %60 = arith.addf %59, %3 : vector<16x32xf32>
    %c0_22 = arith.constant 0 : index
    %c0_23 = arith.constant 0 : index
    %c0_24 = arith.constant 0 : index
    %61 = vector.load %arg9[%c0_22, %c0_23, %c0_24] : memref<1x1x32xf32, #tpu.memory_space<vmem>>, vector<1x1x32xf32>
    %62 = vector.shape_cast %61 : vector<1x1x32xf32> to vector<1x32xf32>
    %c0_25 = arith.constant 0 : index
    %c0_26 = arith.constant 0 : index
    %c0_27 = arith.constant 0 : index
    %63 = vector.load %arg10[%c0_25, %c0_26, %c0_27] : memref<1x1x32xf32, #tpu.memory_space<vmem>>, vector<1x1x32xf32>
    %64 = vector.shape_cast %63 : vector<1x1x32xf32> to vector<1x32xf32>
    %cst_28 = arith.constant dense<0.000000e+00> : vector<16xf32>
    %65 = vector.multi_reduction <add>, %60, %cst_28 [1] : vector<16x32xf32> to vector<16xf32>
    %66 = vector.shape_cast %65 : vector<16xf32> to vector<16x1xf32>
    %cst_29 = arith.constant 3.200000e+01 : f32
    %67 = vector.broadcast %cst_29 : f32 to vector<16x1xf32>
    %68 = arith.divf %66, %67 : vector<16x1xf32>
    %69 = vector.broadcast %68 : vector<16x1xf32> to vector<16x32xf32>
    %70 = arith.subf %60, %69 : vector<16x32xf32>
    %71 = arith.mulf %70, %70 : vector<16x32xf32>
    %cst_30 = arith.constant dense<0.000000e+00> : vector<16xf32>
    %72 = vector.multi_reduction <add>, %71, %cst_30 [1] : vector<16x32xf32> to vector<16xf32>
    %73 = vector.shape_cast %72 : vector<16xf32> to vector<16x1xf32>
    %cst_31 = arith.constant 3.200000e+01 : f32
    %74 = vector.broadcast %cst_31 : f32 to vector<16x1xf32>
    %75 = arith.divf %73, %74 : vector<16x1xf32>
    %76 = vector.broadcast %68 : vector<16x1xf32> to vector<16x32xf32>
    %77 = arith.subf %60, %76 : vector<16x32xf32>
    %cst_32 = arith.constant 9.99999974E-6 : f32
    %78 = vector.broadcast %cst_32 : f32 to vector<16x1xf32>
    %79 = arith.addf %75, %78 : vector<16x1xf32>
    %80 = math.rsqrt %79 : vector<16x1xf32>
    %81 = vector.broadcast %80 : vector<16x1xf32> to vector<16x32xf32>
    %82 = arith.mulf %77, %81 : vector<16x32xf32>
    %83 = vector.broadcast %62 : vector<1x32xf32> to vector<16x32xf32>
    %84 = arith.mulf %82, %83 : vector<16x32xf32>
    %85 = vector.broadcast %64 : vector<1x32xf32> to vector<16x32xf32>
    %86 = arith.addf %84, %85 : vector<16x32xf32>
    %87 = arith.truncf %86 : vector<16x32xf32> to vector<16x32xbf16>
    %c0_33 = arith.constant 0 : index
    %c0_34 = arith.constant 0 : index
    %c0_35 = arith.constant 0 : index
    %88 = vector.load %arg11[%c0_33, %c0_34, %c0_35] : memref<1x32x128xbf16, #tpu.memory_space<vmem>>, vector<1x32x128xbf16>
    %89 = vector.shape_cast %88 : vector<1x32x128xbf16> to vector<32x128xbf16>
    %cst_36 = arith.constant dense<0.000000e+00> : vector<16x128xf32>
    %90 = tpu.matmul %87, %89, %cst_36 {dimension_numbers = #tpu.dot_dimension_numbers<[1], [0], [0], [1], [0, 0, 1, 1], [], []>} : vector<16x32xbf16>, vector<32x128xbf16>, vector<16x128xf32> -> vector<16x128xf32>
    %c0_37 = arith.constant 0 : index
    %c0_38 = arith.constant 0 : index
    %c0_39 = arith.constant 0 : index
    %91 = vector.load %arg12[%c0_37, %c0_38, %c0_39] : memref<1x1x128xf32, #tpu.memory_space<vmem>>, vector<1x1x128xf32>
    %92 = vector.shape_cast %91 : vector<1x1x128xf32> to vector<1x128xf32>
    %93 = vector.broadcast %92 : vector<1x128xf32> to vector<16x128xf32>
    %94 = arith.addf %90, %93 : vector<16x128xf32>
    %95 = arith.mulf %94, %94 : vector<16x128xf32>
    %96 = arith.mulf %94, %95 : vector<16x128xf32>
    %cst_40 = arith.constant 4.471500e-02 : f32
    %97 = vector.broadcast %cst_40 : f32 to vector<16x128xf32>
    %98 = arith.mulf %97, %96 : vector<16x128xf32>
    %99 = arith.addf %94, %98 : vector<16x128xf32>
    %cst_41 = arith.constant 0.797884583 : f32
    %100 = vector.broadcast %cst_41 : f32 to vector<16x128xf32>
    %101 = arith.mulf %100, %99 : vector<16x128xf32>
    %102 = math.tanh %101 : vector<16x128xf32>
    %cst_42 = arith.constant 1.000000e+00 : f32
    %103 = vector.broadcast %cst_42 : f32 to vector<16x128xf32>
    %104 = arith.addf %103, %102 : vector<16x128xf32>
    %cst_43 = arith.constant 5.000000e-01 : f32
    %105 = vector.broadcast %cst_43 : f32 to vector<16x128xf32>
    %106 = arith.mulf %105, %104 : vector<16x128xf32>
    %107 = arith.mulf %94, %106 : vector<16x128xf32>
    %108 = arith.truncf %107 : vector<16x128xf32> to vector<16x128xbf16>
    %c0_44 = arith.constant 0 : index
    %c0_45 = arith.constant 0 : index
    %c0_46 = arith.constant 0 : index
    %109 = vector.load %arg13[%c0_44, %c0_45, %c0_46] : memref<1x128x32xbf16, #tpu.memory_space<vmem>>, vector<1x128x32xbf16>
    %110 = vector.shape_cast %109 : vector<1x128x32xbf16> to vector<128x32xbf16>
    %cst_47 = arith.constant dense<0.000000e+00> : vector<16x32xf32>
    %111 = tpu.matmul %108, %110, %cst_47 {dimension_numbers = #tpu.dot_dimension_numbers<[1], [0], [0], [1], [0, 0, 1, 1], [], []>} : vector<16x128xbf16>, vector<128x32xbf16>, vector<16x32xf32> -> vector<16x32xf32>
    %c0_48 = arith.constant 0 : index
    %c0_49 = arith.constant 0 : index
    %c0_50 = arith.constant 0 : index
    %112 = vector.load %arg14[%c0_48, %c0_49, %c0_50] : memref<1x1x32xf32, #tpu.memory_space<vmem>>, vector<1x1x32xf32>
    %113 = vector.shape_cast %112 : vector<1x1x32xf32> to vector<1x32xf32>
    %114 = vector.broadcast %113 : vector<1x32xf32> to vector<16x32xf32>
    %115 = arith.addf %111, %114 : vector<16x32xf32>
    %116 = arith.addf %115, %86 : vector<16x32xf32>
    %c0_51 = arith.constant 0 : index
    %c0_52 = arith.constant 0 : index
    %c0_53 = arith.constant 0 : index
    %117 = vector.load %arg15[%c0_51, %c0_52, %c0_53] : memref<1x1x32xf32, #tpu.memory_space<vmem>>, vector<1x1x32xf32>
    %118 = vector.shape_cast %117 : vector<1x1x32xf32> to vector<1x32xf32>
    %c0_54 = arith.constant 0 : index
    %c0_55 = arith.constant 0 : index
    %c0_56 = arith.constant 0 : index
    %119 = vector.load %arg16[%c0_54, %c0_55, %c0_56] : memref<1x1x32xf32, #tpu.memory_space<vmem>>, vector<1x1x32xf32>
    %120 = vector.shape_cast %119 : vector<1x1x32xf32> to vector<1x32xf32>
    %cst_57 = arith.constant dense<0.000000e+00> : vector<16xf32>
    %121 = vector.multi_reduction <add>, %116, %cst_57 [1] : vector<16x32xf32> to vector<16xf32>
    %122 = vector.shape_cast %121 : vector<16xf32> to vector<16x1xf32>
    %cst_58 = arith.constant 3.200000e+01 : f32
    %123 = vector.broadcast %cst_58 : f32 to vector<16x1xf32>
    %124 = arith.divf %122, %123 : vector<16x1xf32>
    %125 = vector.broadcast %124 : vector<16x1xf32> to vector<16x32xf32>
    %126 = arith.subf %116, %125 : vector<16x32xf32>
    %127 = arith.mulf %126, %126 : vector<16x32xf32>
    %cst_59 = arith.constant dense<0.000000e+00> : vector<16xf32>
    %128 = vector.multi_reduction <add>, %127, %cst_59 [1] : vector<16x32xf32> to vector<16xf32>
    %129 = vector.shape_cast %128 : vector<16xf32> to vector<16x1xf32>
    %cst_60 = arith.constant 3.200000e+01 : f32
    %130 = vector.broadcast %cst_60 : f32 to vector<16x1xf32>
    %131 = arith.divf %129, %130 : vector<16x1xf32>
    %132 = vector.broadcast %124 : vector<16x1xf32> to vector<16x32xf32>
    %133 = arith.subf %116, %132 : vector<16x32xf32>
    %cst_61 = arith.constant 9.99999974E-6 : f32
    %134 = vector.broadcast %cst_61 : f32 to vector<16x1xf32>
    %135 = arith.addf %131, %134 : vector<16x1xf32>
    %136 = math.rsqrt %135 : vector<16x1xf32>
    %137 = vector.broadcast %136 : vector<16x1xf32> to vector<16x32xf32>
    %138 = arith.mulf %133, %137 : vector<16x32xf32>
    %139 = vector.broadcast %118 : vector<1x32xf32> to vector<16x32xf32>
    %140 = arith.mulf %138, %139 : vector<16x32xf32>
    %141 = vector.broadcast %120 : vector<1x32xf32> to vector<16x32xf32>
    %142 = arith.addf %140, %141 : vector<16x32xf32>
    %c0_62 = arith.constant 0 : index
    %c0_63 = arith.constant 0 : index
    %143 = vector.load %arg25[%c0_62, %c0_63] : memref<16x32xf32, #tpu.memory_space<vmem>>, vector<16x32xf32>
    tpu.vector_store %arg25[%c0_62, %c0_63], %142 {strides = array<i32>} : memref<16x32xf32, #tpu.memory_space<vmem>>, vector<16x32xf32>,
    %c1_i32 = arith.constant 1 : i32
    %144 = arith.cmpi eq, %arg0, %c1_i32 : i32
    %145 = arith.extui %144 : i1 to i32
    %c0_i32_64 = arith.constant 0 : i32
    %146 = arith.cmpi ne, %145, %c0_i32_64 : i32
    scf.if %146 {
      %147 = vector.extract_strided_slice %142 {offsets = [0, 0], sizes = [1, 32], strides = [1, 1]} : vector<16x32xf32> to vector<1x32xf32>
      %148 = vector.extract_strided_slice %142 {offsets = [8, 0], sizes = [1, 32], strides = [1, 1]} : vector<16x32xf32> to vector<1x32xf32>
      %149 = tpu.concatenate %147, %148 in 0 : vector<1x32xf32>, vector<1x32xf32> -> vector<2x32xf32>
      %c0_65 = arith.constant 0 : index
      %c0_66 = arith.constant 0 : index
      %150 = vector.load %arg17[%c0_65, %c0_66] : memref<32x32xf32, #tpu.memory_space<vmem>>, vector<32x32xf32>
      %cst_67 = arith.constant dense<0.000000e+00> : vector<2x32xf32>
      %151 = tpu.matmul %149, %150, %cst_67 {dimension_numbers = #tpu.dot_dimension_numbers<[1], [0], [0], [1], [0, 0, 1, 1], [], []>} : vector<2x32xf32>, vector<32x32xf32>, vector<2x32xf32> -> vector<2x32xf32>
      %c0_68 = arith.constant 0 : index
      %c0_69 = arith.constant 0 : index
      %152 = vector.load %arg18[%c0_68, %c0_69] : memref<1x32xf32, #tpu.memory_space<vmem>>, vector<1x32xf32>
      %153 = vector.broadcast %152 : vector<1x32xf32> to vector<2x32xf32>
      %154 = arith.addf %151, %153 : vector<2x32xf32>
      %155 = math.tanh %154 : vector<2x32xf32>
      %c0_70 = arith.constant 0 : index
      %c0_71 = arith.constant 0 : index
      %156 = vector.load %arg19[%c0_70, %c0_71] : memref<32x2xf32, #tpu.memory_space<vmem>>, vector<32x2xf32>
      %cst_72 = arith.constant dense<0.000000e+00> : vector<2x2xf32>
      %157 = tpu.matmul %155, %156, %cst_72 {dimension_numbers = #tpu.dot_dimension_numbers<[1], [0], [0], [1], [0, 0, 1, 1], [], []>} : vector<2x32xf32>, vector<32x2xf32>, vector<2x2xf32> -> vector<2x2xf32>
      %c0_73 = arith.constant 0 : index
      %c0_74 = arith.constant 0 : index
      %158 = vector.load %arg20[%c0_73, %c0_74] : memref<1x2xf32, #tpu.memory_space<vmem>>, vector<1x2xf32>
      %159 = vector.broadcast %158 : vector<1x2xf32> to vector<2x2xf32>
      %160 = arith.addf %157, %159 : vector<2x2xf32>
      %c0_75 = arith.constant 0 : index
      %c0_76 = arith.constant 0 : index
      %161 = vector.load %arg23[%c0_75, %c0_76] : memref<2x2xf32, #tpu.memory_space<vmem>>, vector<2x2xf32>
      tpu.vector_store %arg23[%c0_75, %c0_76], %160 {strides = array<i32>} : memref<2x2xf32, #tpu.memory_space<vmem>>, vector<2x2xf32>,
      %c0_77 = arith.constant 0 : index
      %c0_78 = arith.constant 0 : index
      %162 = vector.load %arg21[%c0_77, %c0_78] : memref<2x1xi32, #tpu.memory_space<vmem>>, vector<2x1xi32>
      %c0_79 = arith.constant 0 : index
      %c0_80 = arith.constant 0 : index
      %163 = vector.load %arg22[%c0_79, %c0_80] : memref<1x2xf32, #tpu.memory_space<vmem>>, vector<1x2xf32>
      %cst_81 = arith.constant dense<0xFF800000> : vector<2xf32>
      %164 = vector.multi_reduction <maximumf>, %160, %cst_81 [1] : vector<2x2xf32> to vector<2xf32>
      %165 = vector.shape_cast %164 : vector<2xf32> to vector<2x1xf32>
      %166 = vector.broadcast %165 : vector<2x1xf32> to vector<2x2xf32>
      %167 = arith.subf %160, %166 : vector<2x2xf32>
      %168 = math.exp %167 : vector<2x2xf32>
      %cst_82 = arith.constant dense<0.000000e+00> : vector<2xf32>
      %169 = vector.multi_reduction <add>, %168, %cst_82 [1] : vector<2x2xf32> to vector<2xf32>
      %170 = vector.shape_cast %169 : vector<2xf32> to vector<2x1xf32>
      %171 = math.log %170 : vector<2x1xf32>
      %172 = vector.broadcast %171 : vector<2x1xf32> to vector<2x2xf32>
      %173 = arith.subf %167, %172 : vector<2x2xf32>
      %174 = tpu.iota {dimensions = array<i32: 1>} : vector<2x2xi32>
      %175 = vector.broadcast %162 : vector<2x1xi32> to vector<2x2xi32>
      %176 = arith.cmpi eq, %174, %175 : vector<2x2xi32>
      %177 = arith.extui %176 : vector<2x2xi1> to vector<2x2xi32>
      %178 = arith.sitofp %177 : vector<2x2xi32> to vector<2x2xf32>
      %179 = vector.broadcast %163 : vector<1x2xf32> to vector<2x2xf32>
      %180 = arith.mulf %178, %179 : vector<2x2xf32>
      %cst_83 = arith.constant dense<0.000000e+00> : vector<2xf32>
      %181 = vector.multi_reduction <add>, %180, %cst_83 [1] : vector<2x2xf32> to vector<2xf32>
      %182 = vector.shape_cast %181 : vector<2xf32> to vector<2x1xf32>
      %183 = vector.shape_cast %182 : vector<2x1xf32> to vector<1x2x1xf32>
      %cst_84 = arith.constant dense<0.000000e+00> : vector<1xf32>
      %184 = vector.multi_reduction <add>, %183, %cst_84 [1, 2] : vector<1x2x1xf32> to vector<1xf32>
      %185 = vector.shape_cast %184 : vector<1xf32> to vector<1x1x1xf32>
      %186 = vector.extract %185[0, 0, 0] : f32 from vector<1x1x1xf32>
      %187 = arith.mulf %178, %173 : vector<2x2xf32>
      %cst_85 = arith.constant dense<0.000000e+00> : vector<2xf32>
      %188 = vector.multi_reduction <add>, %187, %cst_85 [1] : vector<2x2xf32> to vector<2xf32>
      %189 = vector.shape_cast %188 : vector<2xf32> to vector<2x1xf32>
      %cst_86 = arith.constant 0.000000e+00 : f32
      %190 = vector.broadcast %cst_86 : f32 to vector<2x1xf32>
      %191 = arith.subf %190, %189 : vector<2x1xf32>
      %192 = arith.mulf %191, %182 : vector<2x1xf32>
      %193 = vector.shape_cast %192 : vector<2x1xf32> to vector<1x2x1xf32>
      %cst_87 = arith.constant dense<0.000000e+00> : vector<1xf32>
      %194 = vector.multi_reduction <add>, %193, %cst_87 [1, 2] : vector<1x2x1xf32> to vector<1xf32>
      %195 = vector.shape_cast %194 : vector<1xf32> to vector<1x1x1xf32>
      %196 = vector.extract %195[0, 0, 0] : f32 from vector<1x1x1xf32>
      %197 = vector.broadcast %163 : vector<1x2xf32> to vector<2x2xf32>
      %198 = arith.mulf %173, %197 : vector<2x2xf32>
      %cst_88 = arith.constant 0.000000e+00 : f32
      %199 = vector.broadcast %cst_88 : f32 to vector<2x2xf32>
      %200 = arith.subf %199, %198 : vector<2x2xf32>
      %201 = vector.shape_cast %200 : vector<2x2xf32> to vector<1x2x2xf32>
      %cst_89 = arith.constant dense<0.000000e+00> : vector<1xf32>
      %202 = vector.multi_reduction <add>, %201, %cst_89 [1, 2] : vector<1x2x2xf32> to vector<1xf32>
      %203 = vector.shape_cast %202 : vector<1xf32> to vector<1x1x1xf32>
      %204 = vector.extract %203[0, 0, 0] : f32 from vector<1x1x1xf32>
      %cst_90 = arith.constant 0.899999976 : f32
      %205 = arith.mulf %cst_90, %196 : f32
      %206 = arith.divf %205, %186 : f32
      %cst_91 = arith.constant 5.000000e-02 : f32
      %207 = arith.mulf %cst_91, %204 : f32
      %208 = arith.divf %207, %186 : f32
      %209 = arith.addf %206, %208 : f32
      %210 = vector.broadcast %209 : f32 to vector<1x1xf32>
      %c0_92 = arith.constant 0 : index
      %c0_93 = arith.constant 0 : index
      %211 = vector.load %arg24[%c0_92, %c0_93] : memref<1x1xf32, #tpu.memory_space<vmem>>, vector<1x1xf32>
      tpu.vector_store %arg24[%c0_92, %c0_93], %210 {strides = array<i32>} : memref<1x1xf32, #tpu.memory_space<vmem>>, vector<1x1xf32>,
    } else {
    }
    return
  }
  func.func @transform_0(%arg0: i32) -> (i32, i32) {
    %c0_i32 = arith.constant 0 : i32
    %c0_i32_0 = arith.constant 0 : i32
    %c0_i32_1 = arith.constant 0 : i32
    return %c0_i32, %c0_i32_0 : i32, i32
  }
  func.func @transform_1(%arg0: i32) -> (i32, i32) {
    %c0_i32 = arith.constant 0 : i32
    %c0_i32_0 = arith.constant 0 : i32
    %c0_i32_1 = arith.constant 0 : i32
    return %c0_i32, %c0_i32_0 : i32, i32
  }
  func.func @transform_2(%arg0: i32) -> (i32, i32) {
    %c0_i32 = arith.constant 0 : i32
    %c0_i32_0 = arith.constant 0 : i32
    %c0_i32_1 = arith.constant 0 : i32
    return %c0_i32, %c0_i32_0 : i32, i32
  }
  func.func @transform_3(%arg0: i32) -> (i32, i32) {
    %c0_i32 = arith.constant 0 : i32
    %c0_i32_0 = arith.constant 0 : i32
    %c0_i32_1 = arith.constant 0 : i32
    return %c0_i32, %c0_i32_0 : i32, i32
  }
  func.func @transform_4(%arg0: i32) -> (i32, i32, i32) {
    %c0_i32 = arith.constant 0 : i32
    %c0_i32_0 = arith.constant 0 : i32
    %c0_i32_1 = arith.constant 0 : i32
    return %arg0, %c0_i32, %c0_i32_0 : i32, i32, i32
  }
  func.func @transform_5(%arg0: i32) -> (i32, i32, i32) {
    %c0_i32 = arith.constant 0 : i32
    %c0_i32_0 = arith.constant 0 : i32
    %c0_i32_1 = arith.constant 0 : i32
    return %arg0, %c0_i32, %c0_i32_0 : i32, i32, i32
  }
  func.func @transform_6(%arg0: i32) -> (i32, i32, i32) {
    %c0_i32 = arith.constant 0 : i32
    %c0_i32_0 = arith.constant 0 : i32
    %c0_i32_1 = arith.constant 0 : i32
    return %arg0, %c0_i32, %c0_i32_0 : i32, i32, i32
  }
  func.func @transform_7(%arg0: i32) -> (i32, i32, i32) {
    %c0_i32 = arith.constant 0 : i32
    %c0_i32_0 = arith.constant 0 : i32
    %c0_i32_1 = arith.constant 0 : i32
    return %arg0, %c0_i32, %c0_i32_0 : i32, i32, i32
  }
  func.func @transform_8(%arg0: i32) -> (i32, i32, i32) {
    %c0_i32 = arith.constant 0 : i32
    %c0_i32_0 = arith.constant 0 : i32
    %c0_i32_1 = arith.constant 0 : i32
    return %arg0, %c0_i32, %c0_i32_0 : i32, i32, i32
  }
  func.func @transform_9(%arg0: i32) -> (i32, i32, i32) {
    %c0_i32 = arith.constant 0 : i32
    %c0_i32_0 = arith.constant 0 : i32
    %c0_i32_1 = arith.constant 0 : i32
    return %arg0, %c0_i32, %c0_i32_0 : i32, i32, i32
  }
  func.func @transform_10(%arg0: i32) -> (i32, i32, i32) {
    %c0_i32 = arith.constant 0 : i32
    %c0_i32_0 = arith.constant 0 : i32
    %c0_i32_1 = arith.constant 0 : i32
    return %arg0, %c0_i32, %c0_i32_0 : i32, i32, i32
  }
  func.func @transform_11(%arg0: i32) -> (i32, i32, i32) {
    %c0_i32 = arith.constant 0 : i32
    %c0_i32_0 = arith.constant 0 : i32
    %c0_i32_1 = arith.constant 0 : i32
    return %arg0, %c0_i32, %c0_i32_0 : i32, i32, i32
  }
  func.func @transform_12(%arg0: i32) -> (i32, i32, i32) {
    %c0_i32 = arith.constant 0 : i32
    %c0_i32_0 = arith.constant 0 : i32
    %c0_i32_1 = arith.constant 0 : i32
    return %arg0, %c0_i32, %c0_i32_0 : i32, i32, i32
  }
  func.func @transform_13(%arg0: i32) -> (i32, i32, i32) {
    %c0_i32 = arith.constant 0 : i32
    %c0_i32_0 = arith.constant 0 : i32
    %c0_i32_1 = arith.constant 0 : i32
    return %arg0, %c0_i32, %c0_i32_0 : i32, i32, i32
  }
  func.func @transform_14(%arg0: i32) -> (i32, i32, i32) {
    %c0_i32 = arith.constant 0 : i32
    %c0_i32_0 = arith.constant 0 : i32
    %c0_i32_1 = arith.constant 0 : i32
    return %arg0, %c0_i32, %c0_i32_0 : i32, i32, i32
  }
  func.func @transform_15(%arg0: i32) -> (i32, i32, i32) {
    %c0_i32 = arith.constant 0 : i32
    %c0_i32_0 = arith.constant 0 : i32
    %c0_i32_1 = arith.constant 0 : i32
    return %arg0, %c0_i32, %c0_i32_0 : i32, i32, i32
  }
  func.func @transform_16(%arg0: i32) -> (i32, i32) {
    %c0_i32 = arith.constant 0 : i32
    %c0_i32_0 = arith.constant 0 : i32
    %c0_i32_1 = arith.constant 0 : i32
    return %c0_i32, %c0_i32_0 : i32, i32
  }
  func.func @transform_17(%arg0: i32) -> (i32, i32) {
    %c0_i32 = arith.constant 0 : i32
    %c0_i32_0 = arith.constant 0 : i32
    %c0_i32_1 = arith.constant 0 : i32
    return %c0_i32, %c0_i32_0 : i32, i32
  }
  func.func @transform_18(%arg0: i32) -> (i32, i32) {
    %c0_i32 = arith.constant 0 : i32
    %c0_i32_0 = arith.constant 0 : i32
    %c0_i32_1 = arith.constant 0 : i32
    return %c0_i32, %c0_i32_0 : i32, i32
  }
  func.func @transform_19(%arg0: i32) -> (i32, i32) {
    %c0_i32 = arith.constant 0 : i32
    %c0_i32_0 = arith.constant 0 : i32
    %c0_i32_1 = arith.constant 0 : i32
    return %c0_i32, %c0_i32_0 : i32, i32
  }
  func.func @transform_20(%arg0: i32) -> (i32, i32) {
    %c0_i32 = arith.constant 0 : i32
    %c0_i32_0 = arith.constant 0 : i32
    %c0_i32_1 = arith.constant 0 : i32
    return %c0_i32, %c0_i32_0 : i32, i32
  }
  func.func @transform_21(%arg0: i32) -> (i32, i32) {
    %c0_i32 = arith.constant 0 : i32
    %c0_i32_0 = arith.constant 0 : i32
    %c0_i32_1 = arith.constant 0 : i32
    return %c0_i32, %c0_i32_0 : i32, i32
  }
  func.func @transform_22(%arg0: i32) -> (i32, i32) {
    %c0_i32 = arith.constant 0 : i32
    %c0_i32_0 = arith.constant 0 : i32
    %c0_i32_1 = arith.constant 0 : i32
    return %c0_i32, %c0_i32_0 : i32, i32
  }
  func.func @transform_23(%arg0: i32) -> (i32, i32) {
    %c0_i32 = arith.constant 0 : i32
    %c0_i32_0 = arith.constant 0 : i32
    %c0_i32_1 = arith.constant 0 : i32
    return %c0_i32, %c0_i32_0 : i32, i32
  }
}

</mosaic_0001>

<bundles_post_ra>
// kernel: tpu_custom_call.1
= control target key start
LH: loop header
LB: loop body
LE: loop exit
PB: predicated region body
PF: predicated region fallthrough
CT: control target
= control target key end

     0   :  { %s3672_s0 = inlined_call_operand.hbm [shape: f32[16,32], index: 0, kind: input, shape index: {}]   ;;  %s3673_s1 = inlined_call_operand.vmem [shape: f32[64,64], index: 1, kind: input, shape index: {}]   ;;  %s3674_s2 = inlined_call_operand.hbm [shape: f32[1,32], index: 2, kind: input, shape index: {}]   ;;  %s3675_s3 = inlined_call_operand.hbm [shape: f32[1,32], index: 3, kind: input, shape index: {}]   ;;  %s3676_s4 = inlined_call_operand.vmem [shape: bf16[2,32,96], index: 4, kind: input, shape index: {}]   ;;  %s3677_s5 = inlined_call_operand.hbm [shape: f32[2,1,96], index: 5, kind: input, shape index: {}]   ;;  %s3678_s6 = inlined_call_operand.vmem [shape: bf16[2,32,32], index: 6, kind: input, shape index: {}]   ;;  %s3679_s7 = inlined_call_operand.hbm [shape: f32[2,1,32], index: 7, kind: input, shape index: {}]   ;;  %s3680_s8 = inlined_call_operand.vmem [shape: f32[2,1,32], index: 8, kind: input, shape index: {}]   ;;  %s3681_s9 = inlined_call_operand.vmem [shape: f32[2,1,32], index: 9, kind: input, shape index: {}]   ;;  %s3682_s10 = inlined_call_operand.vmem [shape: bf16[2,32,128], index: 10, kind: input, shape index: {}]   ;;  %s3683_s11 = inlined_call_operand.vmem [shape: f32[2,1,128], index: 11, kind: input, shape index: {}]   ;;  %s3684_s12 = inlined_call_operand.vmem [shape: bf16[2,128,32], index: 12, kind: input, shape index: {}]   ;;  %s3685_s13 = inlined_call_operand.vmem [shape: f32[2,1,32], index: 13, kind: input, shape index: {}]   ;;  %s3686_s14 = inlined_call_operand.vmem [shape: f32[2,1,32], index: 14, kind: input, shape index: {}]   ;;  %s3687_s15 = inlined_call_operand.vmem [shape: f32[2,1,32], index: 15, kind: input, shape index: {}]   ;;  %s3688_s16 = inlined_call_operand.vmem [shape: f32[32,32], index: 16, kind: input, shape index: {}]   ;;  %s3689_s17 = inlined_call_operand.vmem [shape: f32[1,32], index: 17, kind: input, shape index: {}]   ;;  %s3690_s18 = inlined_call_operand.vmem [shape: f32[32,2], index: 18, kind: input, shape index: {}]   ;;  %s3691_s19 = inlined_call_operand.vmem [shape: f32[1,2], index: 19, kind: input, shape index: {}]   ;;  %s3692_s20 = inlined_call_operand.vmem [shape: s32[2,1], index: 20, kind: input, shape index: {}]   ;;  %s3693_s21 = inlined_call_operand.vmem [shape: f32[1,2], index: 21, kind: input, shape index: {}]   ;;  %s3694_s22 = inlined_call_operand.hbm [shape: f32[2,2], index: 22, kind: output, shape index: {0}]   ;;  %s3695_s23 = inlined_call_operand.hbm [shape: f32[1,1], index: 23, kind: output, shape index: {1}]  }
   0x1   :  { %3723 = sst [smem:[#allocation23_spill]] %s3672_s0 }
   0x2   :  { %3724 = sst [smem:[#allocation24_spill]] %s3673_s1 }
   0x3   :  { %3725 = sst [smem:[#allocation25_spill]] %s3674_s2 }
   0x4   :  { %3726 = sst [smem:[#allocation26_spill]] %s3675_s3 }
   0x5   :  { %3727 = sst [smem:[#allocation27_spill]] %s3676_s4 }
   0x6   :  { %3728 = sst [smem:[#allocation28_spill]] %s3677_s5 }
   0x7   :  { %3729 = sst [smem:[#allocation29_spill]] %s3678_s6 }
   0x8   :  { %3730 = sst [smem:[#allocation30_spill]] %s3679_s7 }
   0x9   :  { %3731 = sst [smem:[#allocation31_spill]] %s3682_s10 }
   0xa   :  { %3732 = sst [smem:[#allocation32_spill]] %s3683_s11 }
   0xb   :  { %3733 = sst [smem:[#allocation33_spill]] %s3684_s12 }
   0xc   :  { %3734 = sst [smem:[#allocation34_spill]] %s3685_s13 }
   0xd   :  { %3735 = sst [smem:[#allocation35_spill]] %s3686_s14 }
   0xe   :  { %3736 = sst [smem:[#allocation36_spill]] %s3687_s15 }
   0xf   :  { %3737 = sst [smem:[#allocation37_spill]] %s3688_s16 }
  0x10   :  { %3738 = sst [smem:[#allocation38_spill]] %s3689_s17 }
  0x11   :  { %3739 = sst [smem:[#allocation39_spill]] %s3690_s18 }
  0x12   :  { %3740 = sst [smem:[#allocation40_spill]] %s3691_s19 }
  0x13   :  { %3741 = sst [smem:[#allocation41_spill]] %s3692_s20 }
  0x14   :  { %3742 = sst [smem:[#allocation42_spill]] %s3693_s21 }
  0x15   :  { %3743 = sst [smem:[#allocation43_spill]] %s3694_s22 }
  0x16   :  { %3744 = sst [smem:[#allocation44_spill]] %s3695_s23 }
  0x17   :  { %29 = vsyncpa [#allocation4], 0 }
  0x18   :  { %30 = vsyncpa [#allocation7], 0 }
  0x19   :  { %31 = vsyncpa [#allocation10], 0 }
  0x1a   :  { %33 = vsyncpa [#allocation10 + $0x1], 0 }
  0x1b   :  { %34 = vsyncpa [#allocation5], 0 }
  0x1c   :  { %35 = vsyncpa [#allocation14], 0  ;;  %s3105_s4 = smov 0   ;;  %s3107_s30 = smov 0  }
  0x1d   :  { %s3109_s24 = smov 0   ;;  %s3111_s25 = smov 0  }
  0x1e LB: > { %3745 = sst [smem:[#allocation20_spill]] %s2956_s24  ;;  %s3124_s5 = sadd.s32 4294967295, %s2960_s25   ;;  %s2960_s25 = sphi %s3111_s25, %s3798_s25   ;;  %s2956_s24 = sphi %s3109_s24, %s3800_s24   ;;  %s2952_s30 = sphi %s3107_s30, %s3802_s30   ;;  %s2948_s4 = sphi %s3105_s4, %s3801_s4  }
  0x1f   : > { %p171_p0 = scmp.ne.s32.totalorder %s2952_s30, %s2948_s4  ;;  %p3706_p1 = scmp.eq.s32.totalorder %s3124_s5, 0 }
  0x20   : > { %p2285_p2 = scmp.ge.s32.totalorder %s2960_s25, 1  ;;  %p610_p3 = scmp.lt.s32.totalorder %s2960_s25, 3 }
  0x21   : > { %p3133_p5 = por %p3706_p1, %p171_p0  ;;  %s2962_s2 = smov [#allocation6]  }
  0x22   : > { %p3137_p6 = pnand %p2285_p2, %p610_p3  ;;  %s639_s6 = sshll.u32 %s2962_s2, 4  ;;  %s640_s6 = int_to_ptr.vmem [resolvable:$true] %s639_s6 }
  0x23   : > { %s3746_s1 = scalar_select %p3133_p5, 1, 0 }
  0x24   : > { %s3747_s26 = scalar_select %p3137_p6, 1, 0 }
  0x25   : > { %p2547_p7 = pneg %p3137_p6  ;;  %s3144_s27 = sadd.s32 1, %s2960_s25  }
  0x26   : > { %3748 = sst [smem:[#allocation21_spill]] %s3144_s27  ;;  %s155_s28 = ssub.s32 %s2960_s25, %s3144_s27 }
  0x27   : > { %p3148_p8 = pnand %p2547_p7, %p3706_p1  ;;  %p3154_p9 = scmp.eq.s32.totalorder %s155_s28, 0 }
  0x28   : > { %s158_s3 = sadd.s32 1, %s2956_s24  ;;  %s3751_s2 = sld [smem:[#allocation25_spill]] }
  0x29   : > { %s3749_s7 = scalar_select %p3148_p8, 1, 0 }
  0x2a   : > { %s3750_s29 = scalar_select %p3154_p9, 1, 0 }
  0x2b   : > { %p3169_p12 = pneg %p3148_p8 }
  0x2e   : > { %s2714_s23 = scalar_lea.hbm %s3751_s2, 16 }
  0x2f   : > { %p2715_p11 = scmp.ne.s32.totalorder %s3751_s2, %s2714_s23  ;;  %p2721_p2 = scmp.lt.u32.totalorder %s2714_s23, %s3751_s2 }
  0x31   : > { %p2717_p13 = pnand %p3169_p12, %p2715_p11 }
  0x33   : > { %p2718_p0 = pneg %p2717_p13 }
  0x35   : > { %p2723_p3 = pnand %p2721_p2, %p2718_p0 }
  0x37   : > { %2726 = shalt.err (!%p2723_p3)
}
  0x38   : > { %s2727_s0 = scalar_lea.vmem %s640_s6, 16  ;;  %s2734_s21 = scalar_lea.vmem %s640_s6, 32 }
  0x39   : > { %p2728_p7 = scmp.ne.s32.totalorder %s640_s6, %s2727_s0  ;;  %p2735_p10 = scmp.lt.s32.totalorder %s640_s6, %s640_s6 }
  0x3a   : > { %p2736_p5 = scmp.lt.s32.totalorder %s2734_s21, %s2727_s0 }
  0x3b   : > { %p2730_p4 = pnand %p2728_p7, %p3169_p12 }
  0x3c   : > { %p2737_p6 = por %p2736_p5, %p2735_p10 }
  0x3d   : > { %p2731_p1 = pneg %p2730_p4 }
  0x3f   : > { %p2738_p9 = pnand %p2737_p6, %p2731_p1 }
  0x41   : > { %2741 = shalt.err (!%p2738_p9)
}
  0x42   : > { %2553 = dma.hbm_to_vmem [thread:$0]  (!%p3148_p8), %s3751_s2, 16, %s640_s6, [#allocation7]  }
  0x43   : > { %p3753_p4 = scmp.ne.s32.totalorder %s3750_s29, 0  ;;  %p166_p1 = scmp.eq.s32.totalorder %s2960_s25, 0 }
  0x44   : > { %p2567_p5 = scmp.lt.s32.totalorder %s2960_s25, 2  ;;  %s687_s27 = sand.u32 1, %s2960_s25  }
  0x45   : > { %s3188_s23 = scalar_select %p3753_p4, %s2956_s24, %s158_s3  }
  0x46   : > { %s3710_s28 = sand.u32 1, %s2956_s24   ;;  %p3755_p6 = scmp.ne.s32.totalorder %s2956_s24, %s2952_s30 }
  0x47   : > { %3754 = sst [smem:[#allocation22_spill]] %s3188_s23  ;;  %s2290_s0 = sshll.u32 %s2960_s25, 4 }
  0x48   : > { %p167_p9 = por %p166_p1, %p3755_p6  ;;  %s3756_s4 = sld [smem:[#allocation28_spill]] }
  0x49   : > { %s690_s6 = scalar_lea.vmem [#allocation9], %s3710_s28  ;;  %s3759_s23 = sld [smem:[#allocation30_spill]] }
  0x4a   : > { %s697_s29 = sshll.u32 %s690_s6, 4  ;;  %p3207_p10 = pnand %p2567_p5, %p167_p9  ;;  %s3205_s29 = int_to_ptr.vmem [resolvable:$true] %s697_s29 }
  0x4b   : > { %s3216_s22 = scalar_lea.sflag [#allocation10], %s687_s27 }
  0x4c   : > { %s3758_s3 = scalar_select %p3207_p10, 1, 0 }
  0x4d   : > { %p3716_p13 = pneg %p3207_p10 }
  0x4e   : > { %s3757_s19 = smov %s3756_s4  ;;  %s3201_s17 = scalar_lea.hbm %s3756_s4, %s2290_s0 }
  0x4f   : > { %s3214_s21 = scalar_lea.hbm %s3759_s23, %s2290_s0  ;;  %s2742_s4 = scalar_lea.hbm %s3201_s17, 16 }
  0x50   : > { %p2743_p11 = scmp.ne.s32.totalorder %s3201_s17, %s2742_s4  ;;  %s2747_s18 = scalar_lea.hbm %s3757_s19, 32 }
  0x51   : > { %p2748_p3 = scmp.lt.u32.totalorder %s3201_s17, %s3757_s19  ;;  %p2749_p7 = scmp.lt.u32.totalorder %s2747_s18, %s2742_s4 }
  0x52   : > { %p2745_p0 = pnand %p3716_p13, %p2743_p11  ;;  %p2751_p1 = scmp.lt.u32.totalorder %s2742_s4, %s3201_s17 }
  0x53   : > { %p2750_p4 = por %p2749_p7, %p2748_p3 }
  0x54   : > { %p2746_p2 = pneg %p2745_p0 }
  0x55   : > { %p2752_p5 = por %p2751_p1, %p2750_p4 }
  0x57   : > { %p2753_p6 = pnand %p2752_p5, %p2746_p2 }
  0x59   : > { %2756 = shalt.err (!%p2753_p6)
}
  0x5a   : > { %s2757_s27 = scalar_lea.vmem %s3205_s29, 16  ;;  %s2963_s28 = smov [#allocation9]  }
  0x5b   : > { %p2758_p9 = scmp.ne.s32.totalorder %s3205_s29, %s2757_s27  ;;  %s2762_s0 = sshll.u32 %s2963_s28, 4  ;;  %s2763_s0 = int_to_ptr.vmem [resolvable:$false] %s2762_s0 }
  0x5c   : > { %s2764_s16 = scalar_lea.vmem %s2763_s0, 32  ;;  %p2765_p8 = scmp.lt.s32.totalorder %s3205_s29, %s2763_s0 }
  0x5d   : > { %p2760_p11 = pnand %p2758_p9, %p3716_p13  ;;  %p2766_p3 = scmp.lt.s32.totalorder %s2764_s16, %s2757_s27 }
  0x5f   : > { %p2761_p0 = pneg %p2760_p11  ;;  %p2767_p7 = por %p2766_p3, %p2765_p8 }
  0x61   : > { %p2768_p4 = pnand %p2767_p7, %p2761_p0 }
  0x63   : > { %2771 = shalt.err (!%p2768_p4)
}
  0x64   : > { %2560 = dma.hbm_to_vmem [thread:$0]  (!%p3207_p10), %s3201_s17, 16, %s3205_s29, %s3216_s22  }
  0x65   : > { %s2964_s18 = smov [#allocation3]   ;;  %s3760_s2 = sld [smem:[#allocation23_spill]] }
  0x66   : > { %s622_s25 = sshll.u32 %s2964_s18, 4  ;;  %s623_s25 = int_to_ptr.vmem [resolvable:$true] %s622_s25 }
  0x6b   : > { %s2772_s28 = scalar_lea.hbm %s3760_s2, 256 }
  0x6c   : > { %p2773_p8 = scmp.ne.s32.totalorder %s3760_s2, %s2772_s28  ;;  %p2779_p5 = scmp.lt.u32.totalorder %s2772_s28, %s3760_s2 }
  0x6e   : > { %p2775_p2 = pnand %p2773_p8, %p3169_p12 }
  0x70   : > { %p2776_p1 = pneg %p2775_p2 }
  0x72   : > { %p2781_p6 = pnand %p2779_p5, %p2776_p1 }
  0x74   : > { %2784 = shalt.err (!%p2781_p6)
}
  0x75   : > { %s2785_s17 = scalar_lea.vmem %s623_s25, 256  ;;  %p2793_p3 = scmp.lt.s32.totalorder %s623_s25, %s623_s25 }
  0x76   : > { %p2786_p9 = scmp.ne.s32.totalorder %s623_s25, %s2785_s17  ;;  %p2794_p7 = scmp.lt.s32.totalorder %s2785_s17, %s2785_s17 }
  0x78   : > { %p2788_p11 = pnand %p2786_p9, %p3169_p12  ;;  %p2795_p4 = por %p2794_p7, %p2793_p3 }
  0x7a   : > { %p2789_p0 = pneg %p2788_p11 }
  0x7c   : > { %p2796_p13 = pnand %p2795_p4, %p2789_p0 }
  0x7e   : > { %2799 = shalt.err (!%p2796_p13)
}
  0x7f   : > { %s2965_s19 = smov 128   ;;  %s2966_s29 = smov 8  }
  0x80   : > { %p3761_p8 = scmp.ne.s32.totalorder %s3749_s7, 0  ;;  %s3762_s6 = sand.u32 1, %s2956_s24  }
  0x81   : > { %s715_s28 = scalar_lea.vmem [#allocation11], %s3762_s6  ;;  %s2967_s27 = smov [#allocation8]  }
  0x82   : > { %2550 = dma.hbm_to_vmem [thread:$0]  (!%p3761_p8), %s3760_s2, 256, %s623_s25, [#allocation4], %s2965_s19, %s2965_s19, %s2966_s29  }
  0x83   : > { %s722_s0 = sshll.u32 %s715_s28, 4  ;;  %s650_s16 = sshll.u32 %s2967_s27, 4  ;;  %s3264_s0 = int_to_ptr.vmem [resolvable:$true] %s722_s0  ;;  %s651_s16 = int_to_ptr.vmem [resolvable:$true] %s650_s16 }
  0x84   : > { %s3763_s14 = sld [smem:[#allocation26_spill]] }
  0x8a   : > { %s2800_s13 = scalar_lea.hbm %s3763_s14, 16 }
  0x8b   : > { %p2801_p13 = scmp.ne.s32.totalorder %s3763_s14, %s2800_s13  ;;  %p2807_p5 = scmp.lt.u32.totalorder %s2800_s13, %s3763_s14 }
  0x8d   : > { %p2803_p2 = pnand %p2801_p13, %p3169_p12 }
  0x8f   : > { %p2804_p1 = pneg %p2803_p2 }
  0x91   : > { %p2809_p6 = pnand %p2807_p5, %p2804_p1 }
  0x93   : > { %2812 = shalt.err (!%p2809_p6)
}
  0x94   : > { %s2813_s29 = scalar_lea.vmem %s651_s16, 16  ;;  %s2820_s15 = scalar_lea.vmem %s651_s16, 32 }
  0x95   : > { %p2814_p9 = scmp.ne.s32.totalorder %s651_s16, %s2813_s29  ;;  %p2821_p3 = scmp.lt.s32.totalorder %s651_s16, %s651_s16 }
  0x96   : > { %p2822_p7 = scmp.lt.s32.totalorder %s2820_s15, %s2813_s29 }
  0x97   : > { %p2816_p11 = pnand %p2814_p9, %p3169_p12 }
  0x98   : > { %p2823_p4 = por %p2822_p7, %p2821_p3 }
  0x99   : > { %p2817_p0 = pneg %p2816_p11 }
  0x9b   : > { %p2824_p10 = pnand %p2823_p4, %p2817_p0 }
  0x9d   : > { %2827 = shalt.err (!%p2824_p10)
}
  0x9e   : > { %2556 = dma.hbm_to_vmem [thread:$0]  (!%p3761_p8), %s3763_s14, 16, %s651_s16, [#allocation7]  }
  0x9f   : > { %s2828_s13 = scalar_lea.hbm %s3214_s21, 16  ;;  %p3764_p13 = scmp.ne.s32.totalorder %s3758_s3, 0 }
  0xa0   : > { %p2829_p12 = scmp.ne.s32.totalorder %s3214_s21, %s2828_s13  ;;  %s2833_s4 = scalar_lea.hbm %s3759_s23, 32 }
  0xa1   : > { %p3765_p2 = pneg %p3764_p13  ;;  %p2834_p10 = scmp.lt.u32.totalorder %s3214_s21, %s3759_s23 }
  0xa2   : > { %p2835_p6 = scmp.lt.u32.totalorder %s2833_s4, %s2828_s13  ;;  %p2837_p11 = scmp.lt.u32.totalorder %s2828_s13, %s3214_s21 }
  0xa3   : > { %p2831_p1 = pnand %p2829_p12, %p3765_p2 }
  0xa4   : > { %p2836_p9 = por %p2835_p6, %p2834_p10 }
  0xa5   : > { %p2832_p5 = pneg %p2831_p1 }
  0xa6   : > { %p2838_p0 = por %p2837_p11, %p2836_p9 }
  0xa8   : > { %p2839_p3 = pnand %p2838_p0, %p2832_p5 }
  0xaa   : > { %2842 = shalt.err (!%p2839_p3)
}
  0xab   : > { %s2843_s28 = scalar_lea.vmem %s3264_s0, 16  ;;  %p3766_p7 = pmov %p3765_p2 }
  0xac   : > { %p2844_p8 = scmp.ne.s32.totalorder %s3264_s0, %s2843_s28  ;;  %s2968_s27 = smov [#allocation11]  }
  0xad   : > { %s2848_s16 = sshll.u32 %s2968_s27, 4  ;;  %s2849_s16 = int_to_ptr.vmem [resolvable:$false] %s2848_s16 }
  0xae   : > { %p2846_p4 = pnand %p2844_p8, %p3766_p7  ;;  %s2850_s17 = scalar_lea.vmem %s2849_s16, 32 }
  0xaf   : > { %p2851_p2 = scmp.lt.s32.totalorder %s3264_s0, %s2849_s16  ;;  %p2852_p1 = scmp.lt.s32.totalorder %s2850_s17, %s2843_s28 }
  0xb0   : > { %p2847_p12 = pneg %p2846_p4 }
  0xb1   : > { %p2853_p10 = por %p2852_p1, %p2851_p2 }
  0xb3   : > { %p2854_p6 = pnand %p2853_p10, %p2847_p12 }
  0xb5   : > { %2857 = shalt.err (!%p2854_p6)
}
  0xb6   : > { %2563 = dma.hbm_to_vmem [thread:$0]  (!%p3764_p13), %s3214_s21, 16, %s3264_s0, %s3216_s22  }
  0xb7   : > { %p3767_p5 = scmp.ne.s32.totalorder %s3747_s26, 0 }
  0xb8   : > { %p3768_p9 = scmp.eq.s32.totalorder (!%p3767_p5), %s3124_s5, 0 }
  0xb9   : > { %783 = sbr.rel (%p3767_p5) target bundleno = 4403 (0x1133), region = 108 }
  0xc0   : > { %2927 = dma.done.wait (%p3768_p9), [#allocation4], 256   ;;  %p3769_p11 = pmov %p3768_p9 }
  0xc1   : > { %p3770_p0 = pmov %p3768_p9 }
  0xc2   : > { %2929 = vsyncadd (%p3769_p11), [#allocation4], 4294967040 }
  0xc3   : > { %2931 = dma.done.wait (%p3770_p0), [#allocation7], 32   ;;  %p3771_p3 = pmov %p3770_p0 }
  0xc4   : > { %s797_s3 = sand.u32 1, %s3124_s5   ;;  %s799_s21 = sand.u32 1, %s2952_s30  }
  0xc5   : > { %2933 = vsyncadd (%p3771_p3), [#allocation7], 4294967264  ;;  %s798_s22 = scalar_lea.sflag [#allocation10], %s797_s3  ;;  %s3320_s26 = scalar_lea.vmem [#allocation9], %s799_s21 }
  0xc6   : > { %p3772_p13 = scmp.ne.s32.totalorder %s3746_s1, 0 }
  0xc8   : > { %2935 = dma.done.wait (%p3772_p13), %s798_s22, 32  }
  0xc9   : > { %2937 = vsyncadd (%p3772_p13), %s798_s22, 4294967264  ;;  %p907_p8 = scmp.lt.s32.totalorder %s3124_s5, 1  ;;  %s3773_s12 = sld [smem:[#allocation27_spill]] }
  0xca   : > { %s3774_s4 = sld [smem:[#allocation29_spill]]  ;;  %s3775_s10 = sld [smem:[#allocation31_spill]] }
  0xcb   : > { %s3328_s0 = scalar_select %p907_p8, %s3124_s5, 1 }
  0xcc   : > { %s3776_s29 = sld [smem:[#allocation32_spill]]  ;;  %s3777_s2 = sld [smem:[#allocation33_spill]] }
  0xcd   : > { %s2353_s25 = sshll.u32 %s3328_s0, 4  ;;  %s2356_s11 = sshll.u32 %s3328_s0, 6 }
  0xce   : > { %s3778_s14 = sld [smem:[#allocation34_spill]]  ;;  %s3779_s23 = sld [smem:[#allocation35_spill]] }
  0xcf   : > { %s3338_s13 = scalar_lea.vmem %s3773_s12, %s2353_s25  ;;  %s3376_s22 = scalar_lea.vmem [#allocation11], %s799_s21 }
  0xd0   : > { %s3343_s7 = scalar_lea.vmem %s3774_s4, %s2353_s25  ;;  %s3352_s3 = scalar_lea.vmem %s3775_s10, %s2353_s25 }
  0xd1   : > { %s3780_s10 = sld [smem:[#allocation36_spill]]  ;;  %p3781_p7 = scmp.ne.s32.totalorder %s3124_s5, 0 }
  0xd2   : > { %s930_s1 = scalar_lea.vmem %s3776_s29, %s3328_s0  ;;  %s3362_s20 = scalar_lea.vmem %s3777_s2, %s2356_s11  ;;  %v950_v0 = vld [vmem:[#allocation3] sm:$0xff] (!%p3781_p7)  ;;  %vm954_vm0 = vcmask (!%p3781_p7), 261120   ;;  %v951_v1 = vld [vmem:[#allocation3 + $0x8] sm:$0xff] (!%p3781_p7)  ;;  %v2305_v21 = vld [vmem:[#allocation6] ss:$0 sm:$0xff] (!%p3781_p7) }
  0xd3   : > { %949 = sbr.rel (%p3781_p7) target bundleno = 529 (0x211), region = 132  ;;  %v955_v2 = vsel (!%p3781_p7), %vm954_vm0, %v950_v0, 0.0  ;;  %v958_v3 = vsel (!%p3781_p7), %vm954_vm0, %v951_v1, 0.0  ;;  %v2306_v23 = vld [vmem:[#allocation8] ss:$0 sm:$0xff] (!%p3781_p7) }
  0xd4   : > { %s938_s6 = scalar_lea.vmem %s3778_s14, %s3328_s0  ;;  %s941_s16 = scalar_lea.vmem %s3779_s23, %s3328_s0  ;;  %956 = vadd.xlane.f32.xlu0 (!%p3781_p7), %v955_v2 }
  0xd7   : > { %s944_s24 = scalar_lea.vmem %s3780_s10, %s3328_s0 }
  0xd8   : > { %959 = vadd.xlane.f32.xlu0 (!%p3781_p7), %v958_v3 }
 0x161   : > { %v957_v4 = vpop.xlane.xlu0 %956 }
 0x162   : > { %v962_v5 = vmul.f32 0.03125, %v957_v4 }
 0x164   : > { %v964_v6 = vsub.f32 %v950_v0, %v962_v5 }
 0x165   : > { %v960_v7 = vpop.xlane.xlu0 %959 }
 0x166   : > { %v963_v8 = vmul.f32 0.03125, %v960_v7  ;;  %v966_v9 = vmul.f32 %v964_v6, %v964_v6 }
 0x168   : > { %v965_v10 = vsub.f32 %v951_v1, %v963_v8  ;;  %v968_v11 = vsel %vm954_vm0, %v966_v9, 0.0 }
 0x169   : > { %969 = vadd.xlane.f32.xlu1 %v968_v11 }
 0x16a   : > { %v967_v12 = vmul.f32 %v965_v10, %v965_v10 }
 0x16c   : > { %v971_v13 = vsel %vm954_vm0, %v967_v12, 0.0 }
 0x16d   : > { %972 = vadd.xlane.f32.xlu1 %v971_v13 }
 0x1f6   : > { %v970_v14 = vpop.xlane.xlu1 %969 }
 0x1f7   : > { %v974_v15 = vmul.f32 0.03125, %v970_v14 }
 0x1f9   : > { %v976_v16 = vadd.f32 1e-05, %v974_v15 }
 0x1fa   : > { %v973_v17 = vpop.xlane.xlu1 %972 }
 0x1fb   : > { %2628 = vrsqrt.f32 %v976_v16  ;;  %v975_v18 = vmul.f32 0.03125, %v973_v17 }
 0x1fd   : > { %v977_v19 = vadd.f32 1e-05, %v975_v18 }
 0x1ff   : > { %2630 = vrsqrt.f32 %v977_v19 }
 0x205   : > { %v2629_v20 = vpop.eup %2628 }
 0x206   : > { %v980_v22 = vmul.f32 %v2629_v20, %v964_v6 }
 0x208   : > { %v988_v24 = vmul.f32 %v2305_v21, %v980_v22 }
 0x209   : > { %v2631_v25 = vpop.eup %2630 }
 0x20a   : > { %v996_v26 = vadd.f32 %v2306_v23, %v988_v24  ;;  %v981_v27 = vmul.f32 %v2631_v25, %v965_v10 }
 0x20c   : > { %998 = vst.msk [vmem:[#allocation2] sm:$0xff] %vm954_vm0, %v996_v26  ;;  %v989_v28 = vmul.f32 %v2305_v21, %v981_v27 }
 0x20e   : > { %v997_v29 = vadd.f32 %v2306_v23, %v989_v28 }
 0x210   : > { %999 = vst.msk [vmem:[#allocation2 + $0x8] sm:$0xff] %vm954_vm0, %v997_v29 }
 0x211 PF: > { %v2647_v30 = vld [vmem:[%s3338_s13] sm:$0xff]   ;;  %v2969_v31 = vmov 0.0   ;;  %v2648_v32 = vld [vmem:[%s3338_s13 + $0x8] sm:$0xff]   ;;  %vm2970_vm1 = vmmov 0   ;;  %vm1026_vm2 = vcmask 261120   ;;  %s2971_s10 = smov 112   ;;  %s3783_s27 = scalar_lea.vmem %s3680_s8, %s3328_s0 }
 0x212   : > { %2401 = vmatprep.subr.bf16.mxu0 %v2969_v31  ;;  %2405 = vmatprep.mubr.msk.bf16.mxu0 %vm2970_vm1, %v2969_v31  ;;  %v2307_v36 = vld [vmem:[%s3320_s26] ss:$0 sm:$0xff]  ;;  %s2972_s14 = smov 120   ;;  %vm1127_vm3 = vcmask 64512   ;;  %s2973_s23 = smov 104   ;;  %vm1217_vm4 = vcmask 523264  }
 0x213   : > { %2402 = vmatpush3.bf16.msra.mxu0 %v2647_v30  ;;  %v3391_v33 = vld [vmem:[#allocation2] sm:$0xff]  ;;  %s2974_s2 = smov 96   ;;  %s3782_s15 = sld [smem:[#allocation24_spill]]  ;;  %vm1425_vm5 = vcmask 130048   ;;  %vm1428_vm6 = vcmask 195584  }
 0x214   : > { %2403 = vmatprep.subr.bf16.mxu0 %v2969_v31  ;;  %s2976_s21 = smov 8   ;;  %s2977_s26 = smov 24  }
 0x215   : > { %s2978_s13 = smov 16   ;;  %s3784_s29 = scalar_lea.vmem %s3681_s9, %s3328_s0 }
 0x216   : > { %p2340_p4 = scmp.ne.s32.totalorder %s3124_s5, 1 }
 0x217   : > { %v3393_v34 = vld [vmem:[#allocation2 + $0x8] sm:$0xff]  ;;  %2404 = vmatpush3.bf16.msra.mxu0 %v2648_v32  ;;  %vm2980_vm7 = vmmov (!%p2340_p4), 0   ;;  %vm1800_vm8 = vcmask (!%p2340_p4), 1040384   ;;  %s3792_s17 = sld [smem:[#allocation40_spill]] (!%p2340_p4)  ;;  %vm1971_vm9 = vcmask (!%p2340_p4), 9216   ;;  %vm2005_vm11 = vcmask (!%p2340_p4), 1024  }
 0x218   : > { %v1002_v35 = vpack.c.bf16 %v3393_v34, %v3391_v33  ;;  %vm2056_vm12 = vcmask (!%p2340_p4), 0  }
 0x219   : > { %v1107_v9 = vld [vmem:[%s3782_s15] sm:$0xff]  ;;  %v1109_v11 = vld [vmem:[%s3782_s15 + $0x10] sm:$0xff]  ;;  %v1108_v13 = vld [vmem:[%s3782_s15 + $0x8] sm:$0xff] }
 0x21a   : > { %2406 = vmatmul.mubr.msk.bf16.vlgmr.msra.gmra.mrb[0].mxu0 %vm1026_vm2, %v1002_v35  ;;  %v1110_v20 = vld [vmem:[%s3782_s15 + $0x18] sm:$0xff]  ;;  %v1111_v22 = vld [vmem:[%s3782_s15 + $0x20] sm:$0xff]  ;;  %v1113_v26 = vld [vmem:[%s3782_s15 + $0x30] sm:$0xff] }
 0x21b   : > { %v1112_v28 = vld [vmem:[%s3782_s15 + $0x28] sm:$0xff] }
 0x2ed   : > { %v1064_v37 = vpop.f32.mrb[0].mxu0 }
 0x2ee   : > { %v1065_v38 = vadd.f32 %v2307_v36, %v1064_v37  ;;  %v2407_v39 = vpop.f32.mrb[1].mxu0 }
 0x2ef   : > { %v1067_v40 = vpop.f32.mrb[2].mxu0  ;;  %v1114_v39 = vld [vmem:[%s3782_s15 + $0x38] sm:$0xff] }
 0x2f0   : > { %v1068_v41 = vadd.f32 %v2307_v36, %v1067_v40  ;;  %1079 = vrot.lane.b32.xlu1 %v1065_v38, %s2971_s10  ;;  %1073 = vrot.lane.b32.xlu0 %v1065_v38, %s2972_s14  ;;  %v2408_v42 = vpop.f32.mrb[3].mxu0  ;;  %v1091_v43 = vmul.f32 0.35355338, %v1065_v38 }
 0x2f2   : > { %v1092_v44 = vmul.f32 0.35355338, %v1068_v41  ;;  %v3400_v45 = vpack.c.bf16 %v1068_v41, %v1065_v38 }
 0x2f4   : > { %1081 = vrot.lane.b32.xlu1 %v1068_v41, %s2971_s10  ;;  %1075 = vrot.lane.b32.xlu0 %v1068_v41, %s2972_s14  ;;  %v1099_v46 = vpack.c.bf16 %v1092_v44, %v1091_v43 }
 0x2f6   : > { %2417 = vmatprep.mubr.msk.bf16.mxu1 %vm1127_vm3, %v1099_v46 }
 0x2f8   : > { %1087 = vrot.lane.b32.xlu1 %v1068_v41, %s2973_s23  ;;  %1085 = vrot.lane.b32.xlu0 %v1065_v38, %s2973_s23 }
 0x2fc   : > { %1119 = vrot.lane.b32.xlu0 %v3400_v45, %s2974_s2 }
 0x362   : > { %v1080_v47 = vpop.permute.xlu1 %1079  ;;  %v1074_v48 = vpop.permute.xlu0 %1073 }
 0x363   : > { %v1095_v49 = vmul.f32 0.35355338, %v1080_v47  ;;  %v1093_v50 = vmul.f32 0.35355338, %v1074_v48 }
 0x366   : > { %v1082_v51 = vpop.permute.xlu1 %1081  ;;  %v1076_v52 = vpop.permute.xlu0 %1075 }
 0x367   : > { %v1096_v53 = vmul.f32 0.35355338, %v1082_v51  ;;  %v3404_v54 = vpack.c.bf16 %v1082_v51, %v1080_v47  ;;  %v1094_v55 = vmul.f32 0.35355338, %v1076_v52  ;;  %v3406_v56 = vpack.c.bf16 %v1076_v52, %v1074_v48 }
 0x369   : > { %v1101_v57 = vpack.c.bf16 %v1096_v53, %v1095_v49  ;;  %v1100_v58 = vpack.c.bf16 %v1094_v55, %v1093_v50  ;;  %1121 = vrot.lane.b32.xlu1 %v3406_v56, %s2974_s2  ;;  %1123 = vrot.lane.b32.xlu0 %v3404_v54, %s2974_s2 }
 0x36a   : > { %v1088_v59 = vpop.permute.xlu1 %1087  ;;  %v1086_v60 = vpop.permute.xlu0 %1085 }
 0x36b   : > { %v3410_v61 = vpack.c.bf16 %v1088_v59, %v1086_v60  ;;  %v1098_v6 = vmul.f32 0.35355338, %v1088_v59  ;;  %v1097_v7 = vmul.f32 0.35355338, %v1086_v60 }
 0x36d   : > { %1125 = vrot.lane.b32.xlu1 %v3410_v61, %s2974_s2  ;;  %v1102_v8 = vpack.c.bf16 %v1098_v6, %v1097_v7  ;;  %s2975_s2 = smov 64  }
 0x36e   : > { %v1120_v62 = vpop.permute.xlu0 %1119 }
 0x36f   : > { %2511 = vmatprep.subr.msk.bf16.mxu1 %vm1127_vm3, %v1120_v62  ;;  %v1141_v63 = vsel %vm1127_vm3, %v1120_v62, 0 }
 0x370   : > { %2410 = vmatpush3.bf16.xpose.msra.mxu1 %v1141_v63 }
 0x3db   : > { %v1122_v0 = vpop.permute.xlu1 %1121  ;;  %v1124_v2 = vpop.permute.xlu0 %1123 }
 0x3dc   : > { %2512 = vmatprep.subr.msk.bf16.mxu1 %vm1127_vm3, %v1122_v0  ;;  %v1144_v1 = vsel %vm1127_vm3, %v1122_v0, 0  ;;  %v1147_v3 = vsel %vm1127_vm3, %v1124_v2, 0 }
 0x3dd   : > { %2412 = vmatpush3.bf16.xpose.msra.mxu1 %v1144_v1 }
 0x3de   : > { %2513 = vmatprep.subr.msk.bf16.mxu1 %vm1127_vm3, %v1124_v2 }
 0x3df   : > { %v1126_v4 = vpop.permute.xlu1 %1125 }
 0x3e0   : > { %v1150_v5 = vsel %vm1127_vm3, %v1126_v4, 0 }
 0x3e5   : > { %2414 = vmatpush3.bf16.xpose.msra.mxu1 %v1147_v3 }
 0x3e6   : > { %2514 = vmatprep.subr.msk.bf16.mxu1 %vm1127_vm3, %v1126_v4 }
 0x3ed   : > { %2416 = vmatpush3.bf16.xpose.msra.mxu1 %v1150_v5 }
 0x3ee   : > { %2457 = vmatprep.subr.bf16.mxu1 %v2969_v31 }
 0x3f4   : > { %2418 = vmatmul.mubr.msk.bf16.vlgmr.msra.gmra.mrb[0].mxu1 %vm1127_vm3, %v1100_v58 }
 0x3f5   : > { %2421 = vmatprep.mubr.msk.bf16.mxu1 %vm1127_vm3, %v1101_v57 }
 0x3fc   : > { %2422 = vmatmul.mubr.msk.bf16.gmra.mrb[4].mxu1 %vm1127_vm3, %v1102_v8 }
 0x3fd   : > { %2473 = vmatprep.mubr.msk.bf16.mxu1 %vm2970_vm1, %v2969_v31 }
 0x4c7   : > { %v2419_v10 = vpop.f32.mrb[0].mxu1 }
 0x4c8   : > { %v1186_v12 = vpop.f32.mrb[1].mxu1  ;;  %v1195_v17 = vadd.f32 %v2419_v10, %v1109_v11 }
 0x4c9   : > { %v1187_v14 = vadd.f32 %v1186_v12, %v1107_v9  ;;  %v2420_v15 = vpop.f32.mrb[2].mxu1 }
 0x4ca   : > { %v1189_v16 = vpop.f32.mrb[3].mxu1  ;;  %v1198_v23 = vadd.f32 %v2420_v15, %v1110_v20  ;;  %v1224_v25 = vsel %vm1217_vm4, %v1195_v17, -inf }
 0x4cb   : > { %v1190_v18 = vadd.f32 %v1189_v16, %v1108_v13  ;;  %v1218_v19 = vsel %vm1217_vm4, %v1187_v14, -inf }
 0x4cc   : > { %1219 = vmax.xlane.f32.xlu0 %v1218_v19  ;;  %v1227_v38 = vsel %vm1217_vm4, %v1198_v23, -inf }
 0x4cd   : > { %v1221_v21 = vsel %vm1217_vm4, %v1190_v18, -inf }
 0x4ce   : > { %1222 = vmax.xlane.f32.xlu1 %v1221_v21 }
 0x4cf   : > { %v2423_v24 = vpop.f32.mrb[4].mxu1 }
 0x4d0   : > { %v1202_v27 = vpop.f32.mrb[5].mxu1  ;;  %1225 = vmax.xlane.f32.xlu0 %v1224_v25  ;;  %v1211_v35 = vadd.f32 %v2423_v24, %v1113_v26 }
 0x4d1   : > { %v1203_v29 = vadd.f32 %v1202_v27, %v1111_v22  ;;  %v2424_v30 = vpop.f32.mrb[6].mxu1 }
 0x4d2   : > { %v1205_v32 = vpop.f32.mrb[7].mxu1  ;;  %v1214_v40 = vadd.f32 %v2424_v30, %v1114_v39  ;;  %v1236_v41 = vsel %vm1217_vm4, %v1211_v35, -inf }
 0x4d3   : > { %v1206_v36 = vadd.f32 %v1205_v32, %v1112_v28  ;;  %v1230_v37 = vsel %vm1217_vm4, %v1203_v29, -inf }
 0x4d4   : > { %1231 = vmax.xlane.f32.xlu1 %v1230_v37  ;;  %1228 = vmax.xlane.f32.xlu0 %v1227_v38  ;;  %v1239_v43 = vsel %vm1217_vm4, %v1214_v40, -inf }
 0x4d5   : > { %v1233_v42 = vsel %vm1217_vm4, %v1206_v36, -inf }
 0x4d8   : > { %1237 = vmax.xlane.f32.xlu1 %v1236_v41  ;;  %1234 = vmax.xlane.f32.xlu0 %v1233_v42 }
 0x4dc   : > { %1240 = vmax.xlane.f32.xlu0 %v1239_v43 }
 0x4e9   : > { %1310 = vrot.lane.b32.xlu1 %v3400_v45, %s2975_s2 }
 0x559   : > { %v1220_v44 = vpop.xlane.xlu0 %1219 }
 0x55a   : > { %v1242_v46 = vsub.f32 %v1187_v14, %v1220_v44 }
 0x55b   : > { %v1223_v47 = vpop.xlane.xlu1 %1222 }
 0x55c   : > { %v1250_v50 = vmul.f32 1.442695, %v1242_v46  ;;  %v1243_v52 = vsub.f32 %v1190_v18, %v1223_v47 }
 0x55d   : > { %v1226_v48 = vpop.xlane.xlu0 %1225 }
 0x55e   : > { %v1244_v49 = vsub.f32 %v1195_v17, %v1226_v48  ;;  %v1252_v60 = vmul.f32 1.442695, %v1243_v52 }
 0x560   : > { %v1254_v51 = vmul.f32 1.442695, %v1244_v49 }
 0x561   : > { %v1232_v53 = vpop.xlane.xlu1 %1231  ;;  %v1229_v55 = vpop.xlane.xlu0 %1228 }
 0x562   : > { %2661 = vpow2.f32 %v1254_v51  ;;  %v1245_v57 = vsub.f32 %v1198_v23, %v1229_v55  ;;  %v1246_v58 = vsub.f32 %v1203_v29, %v1232_v53 }
 0x563   : > { %2663 = vpow2.f32 %v1250_v50 }
 0x564   : > { %v1256_v59 = vmul.f32 1.442695, %v1245_v57  ;;  %v1258_v45 = vmul.f32 1.442695, %v1246_v58  ;;  %v2649_v58 = vld [vmem:[%s3343_s7] sm:$0xff]  }
 0x565   : > { %v1238_v62 = vpop.xlane.xlu1 %1237  ;;  %v1235_v63 = vpop.xlane.xlu0 %1234 }
 0x566   : > { %v1248_v0 = vsub.f32 %v1211_v35, %v1238_v62  ;;  %2665 = vpow2.f32 %v1256_v59  ;;  %v1247_v2 = vsub.f32 %v1206_v36, %v1235_v63  ;;  %v2650_v59 = vld [vmem:[%s3343_s7 + $0x8] sm:$0xff]  }
 0x567   : > { %2667 = vpow2.f32 %v1252_v60 }
 0x568   : > { %v1262_v1 = vmul.f32 1.442695, %v1248_v0  ;;  %v1260_v8 = vmul.f32 1.442695, %v1247_v2 }
 0x569   : > { %v1311_v3 = vpop.permute.xlu1 %1310  ;;  %v1241_v4 = vpop.xlane.xlu0 %1240 }
 0x56a   : > { %2669 = vpow2.f32 %v1262_v1  ;;  %v1249_v5 = vsub.f32 %v1214_v40, %v1241_v4  ;;  %2425 = vmatprep.subr.bf16.mxu0 %v1311_v3 }
 0x56b   : > { %2426 = vmatpush3.bf16.msra.mxu0 %v1311_v3  ;;  %2671 = vpow2.f32 %v1258_v45 }
 0x56c   : > { %v3461_v6 = vpop.eup %2661  ;;  %v1264_v7 = vmul.f32 1.442695, %v1249_v5 }
 0x56d   : > { %v1272_v9 = vsel %vm1217_vm4, %v3461_v6, 0.0  ;;  %v2664_v10 = vpop.eup %2663 }
 0x56e   : > { %2673 = vpow2.f32 %v1264_v7  ;;  %1273 = vadd.xlane.f32.xlu1 %v1272_v9  ;;  %v1266_v12 = vsel %vm1217_vm4, %v2664_v10, 0.0 }
 0x56f   : > { %2675 = vpow2.f32 %v1260_v8 }
 0x570   : > { %v2666_v11 = vpop.eup %2665 }
 0x571   : > { %v1275_v13 = vsel %vm1217_vm4, %v2666_v11, 0.0  ;;  %v2668_v14 = vpop.eup %2667 }
 0x572   : > { %1267 = vadd.xlane.f32.xlu1 %v1266_v12  ;;  %1276 = vadd.xlane.f32.xlu0 %v1275_v13  ;;  %v1269_v18 = vsel %vm1217_vm4, %v2668_v14, 0.0 }
 0x574   : > { %v3467_v15 = vpop.eup %2669 }
 0x575   : > { %v1284_v16 = vsel %vm1217_vm4, %v3467_v15, 0.0  ;;  %v2672_v17 = vpop.eup %2671 }
 0x576   : > { %1285 = vadd.xlane.f32.xlu1 %v1284_v16  ;;  %1270 = vadd.xlane.f32.xlu0 %v1269_v18  ;;  %v1278_v20 = vsel %vm1217_vm4, %v2672_v17, 0.0 }
 0x578   : > { %v2674_v19 = vpop.eup %2673 }
 0x579   : > { %v1287_v21 = vsel %vm1217_vm4, %v2674_v19, 0.0  ;;  %v2676_v22 = vpop.eup %2675 }
 0x57a   : > { %1279 = vadd.xlane.f32.xlu1 %v1278_v20  ;;  %1288 = vadd.xlane.f32.xlu0 %v1287_v21  ;;  %v1281_v23 = vsel %vm1217_vm4, %v2676_v22, 0.0 }
 0x57e   : > { %1282 = vadd.xlane.f32.xlu0 %v1281_v23  ;;  %v2319_v23 = vld [vmem:[%s3376_s22] ss:$0 sm:$0xff] }
 0x58b   : > { %1314 = vrot.lane.b32.xlu1 %v3404_v54, %s2975_s2 }
 0x58f   : > { %1316 = vrot.lane.b32.xlu1 %v3410_v61, %s2975_s2 }
 0x594   : > { %1312 = vrot.lane.b32.xlu0 %v3406_v56, %s2975_s2  ;;  %s3789_s2 = sld [smem:[#allocation37_spill]] (!%p2340_p4) }
 0x5fb   : > { %v1274_v24 = vpop.xlane.xlu1 %1273 }
 0x5ff   : > { %v1268_v25 = vpop.xlane.xlu1 %1267  ;;  %v1277_v26 = vpop.xlane.xlu0 %1276 }
 0x600   : > { %2677 = vrcp.f32 %v1268_v25 }
 0x603   : > { %v1286_v27 = vpop.xlane.xlu1 %1285  ;;  %v1271_v28 = vpop.xlane.xlu0 %1270 }
 0x604   : > { %2679 = vrcp.f32 %v1271_v28 }
 0x605   : > { %2681 = vrcp.f32 %v1277_v26 }
 0x606   : > { %2683 = vrcp.f32 %v1274_v24 }
 0x607   : > { %v1289_v29 = vpop.xlane.xlu0 %1288  ;;  %v1280_v30 = vpop.xlane.xlu1 %1279 }
 0x608   : > { %2685 = vrcp.f32 %v1280_v30 }
 0x60a   : > { %v2678_v54 = vpop.eup %2677 }
 0x60b   : > { %v1283_v32 = vpop.xlane.xlu0 %1282  ;;  %v1315_v61 = vpop.permute.xlu1 %1314  ;;  %v1298_v37 = vmul.f32 %v2678_v54, %v2664_v10 }
 0x60c   : > { %2687 = vrcp.f32 %v1283_v32 }
 0x60d   : > { %2689 = vrcp.f32 %v1289_v29 }
 0x60e   : > { %v2680_v35 = vpop.eup %2679  ;;  %2691 = vrcp.f32 %v1286_v27 }
 0x60f   : > { %v1313_v36 = vpop.permute.xlu0 %1312  ;;  %v1299_v56 = vmul.f32 %v2680_v35, %v2668_v14  ;;  %v2682_v39 = vpop.eup %2681 }
 0x610   : > { %2427 = vmatprep.subr.bf16.mxu0 %v1313_v36  ;;  %v2684_v40 = vpop.eup %2683  ;;  %v1317_v42 = vpop.permute.xlu1 %1316  ;;  %v1301_v44 = vmul.f32 %v2682_v39, %v2666_v11 }
 0x611   : > { %2428 = vmatpush3.bf16.msra.mxu0 %v1313_v36  ;;  %v1306_v38 = vpack.c.bf16 %v1299_v56, %v1298_v37  ;;  %v1300_v47 = vmul.f32 %v2684_v40, %v3461_v6 }
 0x612   : > { %2429 = vmatprep.subr.bf16.mxu0 %v1315_v61  ;;  %v2686_v41 = vpop.eup %2685 }
 0x613   : > { %2433 = vmatprep.mubr.msk.bf16.mxu0 %vm1217_vm4, %v1306_v38  ;;  %v1302_v48 = vmul.f32 %v2686_v41, %v2672_v17  ;;  %v1307_v49 = vpack.c.bf16 %v1301_v44, %v1300_v47 }
 0x615   : > { %2430 = vmatpush3.bf16.msra.mxu0 %v1315_v61 }
 0x616   : > { %v2688_v43 = vpop.eup %2687  ;;  %2431 = vmatprep.subr.bf16.mxu0 %v1317_v42 }
 0x617   : > { %v1303_v46 = vmul.f32 %v2688_v43, %v2676_v22  ;;  %v2690_v50 = vpop.eup %2689  ;;  %v2652_v43 = vld [vmem:[%s3352_s3 + $0x8] sm:$0xff]  }
 0x618   : > { %v2692_v52 = vpop.eup %2691  ;;  %v1305_v53 = vmul.f32 %v2690_v50, %v2674_v19 }
 0x619   : > { %2432 = vmatpush3.bf16.msra.mxu0 %v1317_v42  ;;  %v1308_v51 = vpack.c.bf16 %v1303_v46, %v1302_v48  ;;  %v1304_v55 = vmul.f32 %v2692_v52, %v3467_v15  ;;  %v2323_v52 = vld [vmem:[%s3783_s27] ss:$0 sm:$0xff] }
 0x61a   : > { %2441 = vmatprep.subr.bf16.mxu0 %v2969_v31 }
 0x61b   : > { %v1309_v57 = vpack.c.bf16 %v1305_v53, %v1304_v55 }
 0x61c   : > { %2434 = vmatmul.mubr.msk.bf16.vlgmr.msra.gmra.mrb[4].mxu0 %vm1217_vm4, %v1307_v49 }
 0x61d   : > { %2437 = vmatprep.mubr.msk.bf16.mxu0 %vm1217_vm4, %v1308_v51  ;;  %2442 = vmatpush3.bf16.msra.mxu0 %v2649_v58 }
 0x61e   : > { %2443 = vmatprep.subr.bf16.mxu0 %v2969_v31 }
 0x621   : > { %2444 = vmatpush3.bf16.msra.mxu0 %v2650_v59  ;;  %v2324_v59 = vld [vmem:[%s3784_s29] ss:$0 sm:$0xff] }
 0x622   : > { %2449 = vmatprep.subr.bf16.mxu0 %v2969_v31 }
 0x624   : > { %2438 = vmatmul.mubr.msk.bf16.gmra.mrb[8].mxu0 %vm1217_vm4, %v1309_v57 }
 0x625   : > { %2445 = vmatprep.mubr.msk.bf16.mxu0 %vm2970_vm1, %v2969_v31 }
 0x6ef   : > { %v2435_v60 = vpop.f32.mrb[4].mxu0 }
 0x6f0   : > { %v1368_v62 = vpop.f32.mrb[5].mxu0 }
 0x6f1   : > { %v2436_v63 = vpop.f32.mrb[6].mxu0 }
 0x6f2   : > { %v2632_v0 = vpack.i.bf16 %v2436_v63, %v2435_v60  ;;  %v1371_v45 = vpop.f32.mrb[7].mxu0 }
 0x6f4   : > { %2633 = vrot.lane.b32.xlu0 %v2632_v0, %s2976_s21 }
 0x6f7   : > { %v2439_v1 = vpop.f32.mrb[8].mxu0 }
 0x6f8   : > { %v1384_v2 = vpop.f32.mrb[9].mxu0 }
 0x6f9   : > { %v2440_v3 = vpop.f32.mrb[10].mxu0 }
 0x6fa   : > { %v2642_v4 = vpack.i.bf16 %v2440_v3, %v2439_v1  ;;  %v1387_v5 = vpop.f32.mrb[11].mxu0  ;;  %v2654_v1 = vld [vmem:[%s3362_s20 + $0x8] sm:$0xff]   ;;  %v2656_v3 = vld [vmem:[%s3362_s20 + $0x18] sm:$0xff]  }
 0x6fb   : > { %v2637_v6 = vpack.i.bf16 %v1387_v5, %v1384_v2  ;;  %v2655_v2 = vld [vmem:[%s3362_s20 + $0x10] sm:$0xff]   ;;  %v2658_v5 = vld [vmem:[%s3362_s20 + $0x28] sm:$0xff]  }
 0x6fc   : > { %2643 = vrot.lane.b32.xlu0 %v2642_v4, %s2977_s26  ;;  %v2657_v4 = vld [vmem:[%s3362_s20 + $0x20] sm:$0xff]   ;;  %s3794_s26 = sld [smem:[#allocation42_spill]] (!%p2340_p4) }
 0x6fd   : > { %2638 = vrot.lane.b32.xlu1 %v2637_v6, %s2978_s13  ;;  %v2659_v6 = vld [vmem:[%s3362_s20 + $0x30] sm:$0xff]  }
 0x766   : > { %v2634_v7 = vpop.permute.xlu0 %2633 }
 0x767   : > { %v2636_v8 = vunpack.i.h.bf16 %v2634_v7  ;;  %v2635_v9 = vunpack.i.l.bf16 %v2634_v7  ;;  %v2660_v7 = vld [vmem:[%s3362_s20 + $0x38] sm:$0xff]  }
 0x769   : > { %v1423_v14 = vsel %vm1127_vm3, %v1368_v62, %v2635_v9  ;;  %v1424_v15 = vsel %vm1127_vm3, %v1371_v45, %v2636_v8  ;;  %v2653_v45 = vld [vmem:[%s3362_s20] sm:$0xff]  }
 0x76a   : > { %2458 = vmatpush3.bf16.msra.mxu1 %v2653_v45  ;;  %v2325_v8 = vld [vmem:[%s930_s1] ss:$0 sm:$0xff] }
 0x76b   : > { %2459 = vmatprep.subr.bf16.mxu1 %v2969_v31 }
 0x76e   : > { %v2644_v10 = vpop.permute.xlu0 %2643  ;;  %2460 = vmatpush3.bf16.msra.mxu1 %v2654_v1  ;;  %v2339_v1 = vld [vmem:[%s944_s24] ss:$0 sm:$0xff] }
 0x76f   : > { %v2639_v11 = vpop.permute.xlu1 %2638  ;;  %v2646_v16 = vunpack.i.h.bf16 %v2644_v10  ;;  %v2645_v17 = vunpack.i.l.bf16 %v2644_v10  ;;  %2461 = vmatprep.subr.bf16.mxu1 %v2969_v31 }
 0x770   : > { %v2641_v12 = vunpack.i.h.bf16 %v2639_v11  ;;  %v2640_v13 = vunpack.i.l.bf16 %v2639_v11 }
 0x772   : > { %v1427_v18 = vsel %vm1425_vm5, %v1424_v15, %v2641_v12  ;;  %v1426_v19 = vsel %vm1425_vm5, %v1423_v14, %v2640_v13  ;;  %2462 = vmatpush3.bf16.msra.mxu1 %v2655_v2 }
 0x773   : > { %v1430_v20 = vsel %vm1428_vm6, %v1427_v18, %v2646_v16  ;;  %v1429_v21 = vsel %vm1428_vm6, %v1426_v19, %v2645_v17  ;;  %2463 = vmatprep.subr.bf16.mxu1 %v2969_v31 }
 0x774   : > { %v1431_v22 = vpack.c.bf16 %v1430_v20, %v1429_v21 }
 0x776   : > { %2446 = vmatmul.mubr.msk.bf16.vlgmr.msra.gmra.mrb[12].mxu0 %vm1026_vm2, %v1431_v22  ;;  %2464 = vmatpush3.bf16.msra.mxu1 %v2656_v3 }
 0x777   : > { %2453 = vmatprep.mubr.msk.bf16.mxu0 %vm2970_vm1, %v2969_v31  ;;  %2465 = vmatprep.subr.bf16.mxu1 %v2969_v31 }
 0x77a   : > { %2466 = vmatpush3.bf16.msra.mxu1 %v2657_v4 }
 0x77b   : > { %2467 = vmatprep.subr.bf16.mxu1 %v2969_v31 }
 0x77e   : > { %2468 = vmatpush3.bf16.msra.mxu1 %v2658_v5 }
 0x77f   : > { %2469 = vmatprep.subr.bf16.mxu1 %v2969_v31 }
 0x782   : > { %2470 = vmatpush3.bf16.msra.mxu1 %v2659_v6 }
 0x783   : > { %2471 = vmatprep.subr.bf16.mxu1 %v2969_v31 }
 0x786   : > { %2472 = vmatpush3.bf16.msra.mxu1 %v2660_v7  ;;  %v1802_v7 = vld [vmem:[%s3789_s2] sm:$0xff] (!%p2340_p4) }
 0x849   : > { %v1492_v24 = vpop.f32.mrb[12].mxu0 }
 0x84a   : > { %v1493_v25 = vadd.f32 %v2319_v23, %v1492_v24  ;;  %v2447_v26 = vpop.f32.mrb[13].mxu0 }
 0x84b   : > { %v1495_v27 = vpop.f32.mrb[14].mxu0 }
 0x84c   : > { %v1496_v28 = vadd.f32 %v2319_v23, %v1495_v27  ;;  %v2448_v29 = vpop.f32.mrb[15].mxu0  ;;  %v1499_v30 = vadd.f32 %v1493_v25, %v3391_v33 }
 0x84e   : > { %v1503_v32 = vsel %vm1026_vm2, %v1499_v30, 0.0  ;;  %v1500_v54 = vadd.f32 %v1496_v28, %v3393_v34  ;;  %v2651_v34 = vld [vmem:[%s3352_s3] sm:$0xff]   ;;  %s3790_s3 = sld [smem:[#allocation39_spill]] (!%p2340_p4) }
 0x84f   : > { %1504 = vadd.xlane.f32.xlu1 %v1503_v32  ;;  %2450 = vmatpush3.bf16.msra.mxu0 %v2651_v34 }
 0x850   : > { %v1506_v35 = vsel %vm1026_vm2, %v1500_v54, 0.0  ;;  %2451 = vmatprep.subr.bf16.mxu0 %v2969_v31 }
 0x851   : > { %1507 = vadd.xlane.f32.xlu0 %v1506_v35  ;;  %v2329_v35 = vld [vmem:[%s938_s6] ss:$0 sm:$0xff]  ;;  %s3791_s6 = sld [smem:[#allocation38_spill]] (!%p2340_p4) }
 0x853   : > { %2452 = vmatpush3.bf16.msra.mxu0 %v2652_v43 }
 0x8dc   : > { %v1505_v61 = vpop.xlane.xlu1 %1504 }
 0x8dd   : > { %v1510_v36 = vmul.f32 0.03125, %v1505_v61 }
 0x8de   : > { %v1508_v37 = vpop.xlane.xlu0 %1507 }
 0x8df   : > { %v1512_v56 = vsub.f32 %v1499_v30, %v1510_v36  ;;  %v1511_v38 = vmul.f32 0.03125, %v1508_v37 }
 0x8e1   : > { %v1513_v39 = vsub.f32 %v1500_v54, %v1511_v38  ;;  %v1514_v40 = vmul.f32 %v1512_v56, %v1512_v56 }
 0x8e3   : > { %v1516_v41 = vsel %vm1026_vm2, %v1514_v40, 0.0  ;;  %v1515_v33 = vmul.f32 %v1513_v39, %v1513_v39 }
 0x8e4   : > { %1517 = vadd.xlane.f32.xlu0 %v1516_v41 }
 0x8e5   : > { %v1519_v42 = vsel %vm1026_vm2, %v1515_v33, 0.0 }
 0x8e6   : > { %1520 = vadd.xlane.f32.xlu1 %v1519_v42 }
 0x971   : > { %v1518_v44 = vpop.xlane.xlu0 %1517 }
 0x972   : > { %v1522_v46 = vmul.f32 0.03125, %v1518_v44 }
 0x973   : > { %v1521_v47 = vpop.xlane.xlu1 %1520 }
 0x974   : > { %v1524_v48 = vadd.f32 1e-05, %v1522_v46  ;;  %v1523_v49 = vmul.f32 0.03125, %v1521_v47 }
 0x976   : > { %2693 = vrsqrt.f32 %v1524_v48  ;;  %v1525_v50 = vadd.f32 1e-05, %v1523_v49 }
 0x978   : > { %2695 = vrsqrt.f32 %v1525_v50 }
 0x980   : > { %v2694_v51 = vpop.eup %2693 }
 0x981   : > { %v1528_v53 = vmul.f32 %v2694_v51, %v1512_v56 }
 0x982   : > { %v2696_v55 = vpop.eup %2695 }
 0x983   : > { %v1536_v57 = vmul.f32 %v2323_v52, %v1528_v53  ;;  %v1529_v58 = vmul.f32 %v2696_v55, %v1513_v39 }
 0x985   : > { %v1537_v60 = vmul.f32 %v2323_v52, %v1529_v58  ;;  %v3519_v62 = vadd.f32 %v2324_v59, %v1536_v57 }
 0x987   : > { %v3521_v63 = vadd.f32 %v2324_v59, %v1537_v60 }
 0x989   : > { %v1546_v0 = vpack.c.bf16 %v3521_v63, %v3519_v62 }
 0x98b   : > { %2454 = vmatmul.mubr.msk.bf16.vlgmr.msra.gmra.mrb[16].mxu0 %vm1026_vm2, %v1546_v0 }
 0xa5e   : > { %v1607_v9 = vpop.f32.mrb[16].mxu0 }
 0xa5f   : > { %v1608_v10 = vadd.f32 %v2325_v8, %v1607_v9  ;;  %v2455_v11 = vpop.f32.mrb[17].mxu0  ;;  %v1804_v9 = vld [vmem:[%s3789_s2 + $0x10] sm:$0xff] (!%p2340_p4) }
 0xa60   : > { %v1610_v12 = vpop.f32.mrb[18].mxu0 }
 0xa61   : > { %v1614_v13 = vmul.f32 %v1608_v10, %v1608_v10  ;;  %v1611_v14 = vadd.f32 %v2325_v8, %v1610_v12  ;;  %v2456_v15 = vpop.f32.mrb[19].mxu0  ;;  %v1803_v8 = vld [vmem:[%s3789_s2 + $0x8] sm:$0xff] (!%p2340_p4)  ;;  %v1805_v12 = vld [vmem:[%s3789_s2 + $0x18] sm:$0xff] (!%p2340_p4) }
 0xa62   : > { %v2500_v11 = vpack.c.bf16 (!%p2340_p4), %v1803_v8, %v1802_v7 }
 0xa63   : > { %v1616_v16 = vmul.f32 %v1614_v13, %v1608_v10  ;;  %v1615_v17 = vmul.f32 %v1611_v14, %v1611_v14  ;;  %v2981_v13 = vmov (!%p2340_p4), 0.0  }
 0xa64   : > { %2485 = vmatprep.mubr.msk.f32.mxu0 (!%p2340_p4), %vm2980_vm7, %v2981_v13 }
 0xa65   : > { %v1618_v18 = vmul.f32 0.044715, %v1616_v16  ;;  %v1617_v19 = vmul.f32 %v1615_v17, %v1611_v14  ;;  %v1887_v17 = vld [vmem:[%s3790_s3] sm:$0xff] (!%p2340_p4) }
 0xa67   : > { %v1620_v20 = vadd.f32 %v1618_v18, %v1608_v10  ;;  %v1619_v31 = vmul.f32 0.044715, %v1617_v19  ;;  %v1888_v18 = vld [vmem:[%s3790_s3 + $0x8] sm:$0xff] (!%p2340_p4)  ;;  %v1889_v19 = vld [vmem:[%s3790_s3 + $0x10] sm:$0xff] (!%p2340_p4) }
 0xa69   : > { %v1622_v21 = vmul.f32 0.7978846, %v1620_v20  ;;  %v1621_v22 = vadd.f32 %v1619_v31, %v1611_v14  ;;  %v2506_v20 = vpack.c.bf16 (!%p2340_p4), %v1888_v18, %v1887_v17  ;;  %v1890_v31 = vld [vmem:[%s3790_s3 + $0x18] sm:$0xff] (!%p2340_p4) }
 0xa6b   : > { %2697 = vtanh.f32 %v1622_v21  ;;  %v1623_v23 = vmul.f32 0.7978846, %v1621_v22  ;;  %v2509_v21 = vpack.c.bf16 (!%p2340_p4), %v1890_v31, %v1889_v19  ;;  %v2341_v22 = vld [vmem:[%s3791_s6] ss:$0 sm:$0xff] (!%p2340_p4) }
 0xa6d   : > { %2699 = vtanh.f32 %v1623_v23 }
 0xa75   : > { %v2698_v24 = vpop.eup %2697 }
 0xa76   : > { %v1626_v25 = vadd.f32 1.0, %v2698_v24 }
 0xa77   : > { %v2700_v26 = vpop.eup %2699 }
 0xa78   : > { %v1628_v27 = vmul.f32 0.5, %v1626_v25  ;;  %v1627_v28 = vadd.f32 1.0, %v2700_v26 }
 0xa7a   : > { %v1629_v29 = vmul.f32 0.5, %v1627_v28  ;;  %v1630_v30 = vmul.f32 %v1628_v27, %v1608_v10  ;;  %v2979_v10 = vmov (!%p2340_p4), 0.0|0.0   ;;  %v2982_v27 = vmov (!%p2340_p4), 0   ;;  %v2343_v28 = vld [vmem:[%s3792_s17] ss:$0 sm:$0xff] (!%p2340_p4) }
 0xa7b   : > { %2499 = vmatprep.subr.bf16.mxu0 (!%p2340_p4), %v2979_v10  ;;  %2505 = vmatprep.subr.bf16.mxu1 (!%p2340_p4), %v2979_v10 }
 0xa7c   : > { %v1631_v32 = vmul.f32 %v1629_v29, %v1611_v14  ;;  %2501 = vmatpush3.bf16.msra.mxu0 (!%p2340_p4), %v2500_v11  ;;  %v2503_v14 = vpack.c.bf16 (!%p2340_p4), %v1805_v12, %v1804_v9  ;;  %2705 = vset.pattern.permute.xlu0 (!%p2340_p4), %v2982_v27 }
 0xa7d   : > { %2502 = vmatprep.subr.bf16.mxu0 (!%p2340_p4), %v2979_v10 }
 0xa7e   : > { %v1632_v54 = vpack.c.bf16 %v1631_v32, %v1630_v30 }
 0xa80   : > { %2474 = vmatmul.mubr.bf16.vlgmr.msra.gmra.mrb[8].mxu1 %v1632_v54  ;;  %2504 = vmatpush3.bf16.msra.mxu0 (!%p2340_p4), %v2503_v14 }
 0xa81   : > { %2496 = vmatprep.mubr.msk.f32.mxu1 (!%p2340_p4), %vm2980_vm7, %v2981_v13  ;;  %2507 = vmatpush3.bf16.msra.mxu1 (!%p2340_p4), %v2506_v20 }
 0xa82   : > { %2508 = vmatprep.subr.bf16.mxu1 (!%p2340_p4), %v2979_v10 }
 0xa85   : > { %2510 = vmatpush3.bf16.msra.mxu1 (!%p2340_p4), %v2509_v21 }
 0xb53   : > { %v1738_v61 = vpop.f32.mrb[8].mxu1 }
 0xb54   : > { %v1739_v36 = vadd.f32 %v2329_v35, %v1738_v61  ;;  %v2475_v37 = vpop.f32.mrb[9].mxu1 }
 0xb55   : > { %v1741_v56 = vpop.f32.mrb[10].mxu1  ;;  %v1987_v37 = vlaneseq (!%p2340_p4) }
 0xb56   : > { %v1742_v38 = vadd.f32 %v2329_v35, %v1741_v56  ;;  %v2476_v39 = vpop.f32.mrb[11].mxu1  ;;  %v1745_v40 = vadd.f32 %v1739_v36, %v3519_v62 }
 0xb58   : > { %v1749_v41 = vsel %vm1026_vm2, %v1745_v40, 0.0  ;;  %v1746_v33 = vadd.f32 %v1742_v38, %v3521_v63  ;;  %v2338_v63 = vld [vmem:[%s941_s16] ss:$0 sm:$0xff]  ;;  %s3793_s16 = sld [smem:[#allocation41_spill]] (!%p2340_p4)  ;;  %v1988_v38 = vand.u32 (!%p2340_p4), 127, %v1987_v37 }
 0xb59   : > { %1750 = vadd.xlane.f32.xlu0 %v1749_v41  ;;  %v2346_v41 = vld [vmem:[%s3794_s26] ss:$0 sm:$0xff] (!%p2340_p4) }
 0xb5a   : > { %v1752_v42 = vsel %vm1026_vm2, %v1746_v33, 0.0 }
 0xb5b   : > { %1753 = vadd.xlane.f32.xlu1 %v1752_v42 }
 0xb5e   : > { %v1973_v35 = vld [vmem:[%s3793_s16] sm:$0x3] (!%p2340_p4) }
 0xbe6   : > { %v1751_v34 = vpop.xlane.xlu0 %1750 }
 0xbe7   : > { %v1755_v43 = vmul.f32 0.03125, %v1751_v34 }
 0xbe8   : > { %v1754_v44 = vpop.xlane.xlu1 %1753 }
 0xbe9   : > { %v1757_v46 = vsub.f32 %v1745_v40, %v1755_v43  ;;  %v1756_v47 = vmul.f32 0.03125, %v1754_v44 }
 0xbeb   : > { %v1758_v48 = vsub.f32 %v1746_v33, %v1756_v47  ;;  %v1759_v49 = vmul.f32 %v1757_v46, %v1757_v46 }
 0xbed   : > { %v1761_v50 = vsel %vm1026_vm2, %v1759_v49, 0.0  ;;  %v1760_v51 = vmul.f32 %v1758_v48, %v1758_v48 }
 0xbee   : > { %1762 = vadd.xlane.f32.xlu0 %v1761_v50 }
 0xbef   : > { %v1764_v52 = vsel %vm1026_vm2, %v1760_v51, 0.0 }
 0xbf0   : > { %1765 = vadd.xlane.f32.xlu1 %v1764_v52 }
 0xc7b   : > { %v1763_v53 = vpop.xlane.xlu0 %1762 }
 0xc7c   : > { %v1767_v55 = vmul.f32 0.03125, %v1763_v53 }
 0xc7d   : > { %v1766_v57 = vpop.xlane.xlu1 %1765 }
 0xc7e   : > { %v1769_v58 = vadd.f32 1e-05, %v1767_v55  ;;  %v1768_v59 = vmul.f32 0.03125, %v1766_v57 }
 0xc80   : > { %2701 = vrsqrt.f32 %v1769_v58  ;;  %v1770_v60 = vadd.f32 1e-05, %v1768_v59 }
 0xc82   : > { %2703 = vrsqrt.f32 %v1770_v60 }
 0xc8a   : > { %v2702_v62 = vpop.eup %2701 }
 0xc8b   : > { %v1773_v0 = vmul.f32 %v2702_v62, %v1757_v46 }
 0xc8c   : > { %v2704_v45 = vpop.eup %2703 }
 0xc8d   : > { %v1781_v2 = vmul.f32 %v2338_v63, %v1773_v0  ;;  %v1774_v3 = vmul.f32 %v2704_v45, %v1758_v48  ;;  %1796 = sbr.rel (%p2340_p4) target bundleno = 4343 (0x10f7), region = 136 }
 0xc8f   : > { %v1789_v4 = vadd.f32 %v2339_v1, %v1781_v2  ;;  %v1782_v5 = vmul.f32 %v2338_v63, %v1774_v3 }
 0xc91   : > { %1791 = vst.msk [vmem:[#allocation2] sm:$0xff] %vm1026_vm2, %v1789_v4  ;;  %v1790_v6 = vadd.f32 %v2339_v1, %v1782_v5 }
 0xc93   : > { %1792 = vst.msk [vmem:[#allocation2 + $0x8] sm:$0xff] %vm1026_vm2, %v1790_v6  ;;  %v1798_v15 = vrot.slane (!%p2340_p4), %v1790_v6, 7 }
 0xc95   : > { %v1801_v16 = vsel %vm1800_vm8, %v1789_v4, %v1798_v15 }
 0xc96   : > { %2486 = vmatmul.mubr.msk.f32.vlgmr.msra.gmra.mrb[0].mxu0 %vm1026_vm2, %v1801_v16 }
 0xd69   : > { %v1882_v23 = vpop.f32.mrb[0].mxu0 }
 0xd6a   : > { %v1883_v24 = vadd.f32 %v2341_v22, %v1882_v23  ;;  %v2487_v25 = vpop.f32.mrb[1].mxu0 }
 0xd6c   : > { %2706 = vtanh.f32 %v1883_v24 }
 0xd76   : > { %v2707_v26 = vpop.eup %2706 }
 0xd77   : > { %2497 = vmatmul.mubr.msk.f32.vlgmr.msra.gmra.mrb[0].mxu1 %vm1026_vm2, %v2707_v26 }
 0xe4a   : > { %v1967_v29 = vpop.f32.mrb[0].mxu1 }
 0xe4b   : > { %v1968_v30 = vadd.f32 %v2343_v28, %v1967_v29  ;;  %v2498_v32 = vpop.f32.mrb[1].mxu1 }
 0xe4d   : > { %1972 = vst.msk [vmem:[#allocation12] sm:$0x3] %vm1971_vm9, %v1968_v30  ;;  %v1975_v54 = vsel %vm1971_vm9, %v1968_v30, -inf }
 0xe4e   : > { %1976 = vmax.xlane.f32.xlu0 %v1975_v54 }
 0xe64   : > { %1990 = vperm.xlu0 %2705, %v1973_v35  }
 0xedb   : > { %v1977_v61 = vpop.xlane.xlu0 %1976 }
 0xedc   : > { %v1978_v36 = vsub.f32 %v1968_v30, %v1977_v61 }
 0xede   : > { %v1979_v56 = vmul.f32 1.442695, %v1978_v36 }
 0xee0   : > { %2708 = vpow2.f32 %v1979_v56 }
 0xee3   : > { %v1991_v39 = vpop.permute.xlu0 %1990 }
 0xee4   : > { %vm1992_vm10 = vcmp.eq.s32.totalorder %v1988_v38, %v1991_v39 }
 0xee5   : > { %v2345_v40 = vsel %vm1992_vm10, 1.0, %v2981_v13 }
 0xee6   : > { %v2001_v33 = vmul.f32 %v2346_v41, %v2345_v40 }
 0xee8   : > { %v2002_v43 = vsel %vm1971_vm9, %v2001_v33, 0.0 }
 0xeea   : > { %v2709_v42 = vpop.eup %2708 }
 0xeeb   : > { %v1981_v34 = vsel %vm1971_vm9, %v2709_v42, 0.0 }
 0xeec   : > { %1982 = vadd.xlane.f32.xlu1 %v1981_v34 }
 0xef0   : > { %2003 = vadd.xlane.f32.xlu1 %v2002_v43 }
 0xf79   : > { %v1983_v44 = vpop.xlane.xlu1 %1982 }
 0xf7a   : > { %2710 = vlog2.f32 %v1983_v44 }
 0xf7d   : > { %v2004_v50 = vpop.xlane.xlu1 %2003 }
 0xf7e   : > { %v2006_v52 = vsel %vm2005_vm11, %v2004_v50, 0.0 }
 0xf84   : > { %v2711_v46 = vpop.eup %2710 }
 0xf85   : > { %v1985_v47 = vmul.f32 0.6931472, %v2711_v46 }
 0xf87   : > { %v1986_v48 = vsub.f32 %v1978_v36, %v1985_v47 }
 0xf89   : > { %v2016_v49 = vmul.f32 %v2345_v40, %v1986_v48  ;;  %v2032_v57 = vmul.f32 %v2346_v41, %v1986_v48 }
 0xf8b   : > { %v2017_v51 = vsel %vm1971_vm9, %v2016_v49, 0.0  ;;  %v2033_v62 = vsub.f32 0.0, %v2032_v57 }
 0xf8c   : > { %2018 = vadd.xlane.f32.xlu1 %v2017_v51 }
 0xf8d   : > { %v2034_v45 = vsel %vm1971_vm9, %v2033_v62, 0.0 }
 0xf90   : > { %2007 = vadd.xlane.f32.xlu1 %v2006_v52 }
0x1019   : > { %v2019_v53 = vpop.xlane.xlu1 %2018 }
0x101a   : > { %v2020_v55 = vsub.f32 0.0, %v2019_v53 }
0x101c   : > { %v2021_v58 = vmul.f32 %v2020_v55, %v2004_v50 }
0x101d   : > { %v2008_v59 = vpop.xlane.xlu1 %2007 }
0x101e   : > { %v2022_v60 = vsel %vm2005_vm11, %v2021_v58, 0.0  ;;  %v2009_v63 = vrot.slane %v2008_v59, 4 }
0x101f   : > { %2023 = vadd.xlane.f32.xlu1 %v2022_v60 }
0x1020   : > { %v2010_v0 = vadd.f32 %v2009_v63, %v2008_v59 }
0x1022   : > { %v2011_v1 = vrot.slane %v2010_v0, 2 }
0x1023   : > { %2035 = vadd.xlane.f32.xlu1 %v2034_v45 }
0x1024   : > { %v2012_v2 = vadd.f32 %v2011_v1, %v2010_v0 }
0x1026   : > { %v2013_v3 = vrot.slane %v2012_v2, 1 }
0x1028   : > { %v2014_v4 = vadd.f32 %v2013_v3, %v2012_v2 }
0x102a   : > { %2515 = vpush %v2014_v4 }
0x105b   : > { %s2516_s24 = spop %2515 }
0x105c   : > { %v2045_v8 = vstv %s2516_s24 }
0x105d   : > { %2712 = vrcp.f32 %v2045_v8 }
0x1067   : > { %v2713_v20 = vpop.eup %2712 }
0x10ac   : > { %v2024_v5 = vpop.xlane.xlu1 %2023 }
0x10ad   : > { %v2025_v6 = vrot.slane %v2024_v5, 4 }
0x10af   : > { %v2026_v7 = vadd.f32 %v2025_v6, %v2024_v5 }
0x10b0   : > { %v2036_v9 = vpop.xlane.xlu1 %2035 }
0x10b1   : > { %v2027_v10 = vrot.slane %v2026_v7, 2  ;;  %v2037_v11 = vrot.slane %v2036_v9, 4 }
0x10b3   : > { %v2038_v12 = vadd.f32 %v2037_v11, %v2036_v9  ;;  %v2028_v13 = vadd.f32 %v2027_v10, %v2026_v7 }
0x10b5   : > { %v2039_v14 = vrot.slane %v2038_v12, 2  ;;  %v2029_v15 = vrot.slane %v2028_v13, 1 }
0x10b7   : > { %v2040_v16 = vadd.f32 %v2039_v14, %v2038_v12  ;;  %v2030_v17 = vadd.f32 %v2029_v15, %v2028_v13 }
0x10b9   : > { %2517 = vpush %v2030_v17  ;;  %v2041_v18 = vrot.slane %v2040_v16, 1 }
0x10bb   : > { %v2042_v19 = vadd.f32 %v2041_v18, %v2040_v16 }
0x10bd   : > { %2519 = vpush %v2042_v19 }
0x10be   : > { %2521 = vpush %v2713_v20 }
0x10ea   : > { %s2518_s0 = spop %2517 }
0x10eb   : > { %s2044_s13 = smul.f32 0.9, %s2518_s0 }
0x10ee   : > { %s2520_s7 = spop %2519 }
0x10ef   : > { %s2049_s22 = smul.f32 0.05, %s2520_s7  ;;  %s2522_s27 = spop %2521 }
0x10f0   : > { %s2048_s19 = smul.f32 %s2522_s27, %s2044_s13 }
0x10f1   : > { %s2053_s29 = smul.f32 %s2522_s27, %s2049_s22 }
0x10f3   : > { %s2054_s11 = sadd.f32 %s2053_s29, %s2048_s19 }
0x10f5   : > { %v2055_v31 = vstv %s2054_s11 }
0x10f6   : > { %2057 = vst.msk [vmem:[#allocation13] sm:$0x1] %vm2056_vm12, %v2055_v31 }
0x10f7 PF: > { %p2571_p12 = scmp.eq.s32.totalorder %s3124_s5, 1  ;;  %s2983_s12 = smov [#allocation12]  }
0x10f8   : > { %s2065_s18 = sshll.u32 %s2983_s12, 4  ;;  %s2984_s1 = smov [#allocation13]   ;;  %s2066_s18 = int_to_ptr.vmem [resolvable:$true] %s2065_s18 }
0x10f9   : > { %s2076_s20 = sshll.u32 %s2984_s1, 4  ;;  %s2858_s4 = scalar_lea.vmem %s2066_s18, 32  ;;  %s2077_s20 = int_to_ptr.vmem [resolvable:$true] %s2076_s20 }
0x10fa   : > { %p2859_p2 = scmp.ne.s32.totalorder %s2066_s18, %s2858_s4  ;;  %p2865_p6 = scmp.lt.s32.totalorder %s2066_s18, %s2066_s18 }
0x10fb   : > { %p2866_p5 = scmp.lt.s32.totalorder %s2858_s4, %s2858_s4 }
0x10fc   : > { %p2860_p1 = pnand %p2859_p2, %p2571_p12 }
0x10fd   : > { %p2867_p9 = por %p2866_p5, %p2865_p6 }
0x10fe   : > { %p2861_p10 = pneg %p2860_p1 }
0x1100   : > { %p2868_p11 = pnand %p2867_p9, %p2861_p10 }
0x1102   : > { %2871 = shalt.err (!%p2868_p11)
}
0x1103   : > { %s3795_s25 = sld [smem:[#allocation43_spill]] }
0x1109   : > { %s3796_s17 = smov %s3795_s25  ;;  %s2872_s10 = scalar_lea.hbm %s3795_s25, 32 }
0x110a   : > { %p2873_p0 = scmp.ne.s32.totalorder %s3796_s17, %s2872_s10  ;;  %p2878_p8 = scmp.lt.u32.totalorder %s2872_s10, %s3796_s17 }
0x110c   : > { %p2874_p3 = pnand %p2873_p0, %p2571_p12 }
0x110e   : > { %p2875_p13 = pneg %p2874_p3 }
0x1110   : > { %p2880_p7 = pnand %p2878_p8, %p2875_p13 }
0x1112   : > { %2883 = shalt.err (!%p2880_p7)
}
0x1113   : > { %2540 = dma.vmem_to_hbm [thread:$0]  (%p2571_p12), %s2066_s18, 32, %s3796_s17, [#allocation5]  }
0x1114   : > { %s2884_s0 = scalar_lea.vmem %s2077_s20, 16  ;;  %s2890_s13 = scalar_lea.vmem %s2077_s20, 32 }
0x1115   : > { %p2885_p4 = scmp.ne.s32.totalorder %s2077_s20, %s2884_s0  ;;  %p2891_p10 = scmp.lt.s32.totalorder %s2077_s20, %s2077_s20 }
0x1116   : > { %p2892_p6 = scmp.lt.s32.totalorder %s2890_s13, %s2884_s0 }
0x1117   : > { %p2886_p2 = pnand %p2885_p4, %p2571_p12 }
0x1118   : > { %p2893_p5 = por %p2892_p6, %p2891_p10 }
0x1119   : > { %p2887_p1 = pneg %p2886_p2 }
0x111b   : > { %p2894_p9 = pnand %p2893_p5, %p2887_p1 }
0x111d   : > { %2897 = shalt.err (!%p2894_p9)
}
0x111e   : > { %s3797_s27 = sld [smem:[#allocation44_spill]] }
0x1124   : > { %s2898_s19 = scalar_lea.hbm %s3797_s27, 16 }
0x1125   : > { %p2899_p11 = scmp.ne.s32.totalorder %s3797_s27, %s2898_s19  ;;  %p2904_p13 = scmp.lt.u32.totalorder %s2898_s19, %s3797_s27 }
0x1127   : > { %p2900_p0 = pnand %p2899_p11, %p2571_p12 }
0x1129   : > { %p2901_p3 = pneg %p2900_p0 }
0x112b   : > { %p2906_p8 = pnand %p2904_p13, %p2901_p3 }
0x112d   : > { %2909 = shalt.err (!%p2906_p8)
}
0x112e   : > { %2542 = dma.vmem_to_hbm [thread:$0]  (%p2571_p12), %s2077_s20, 16, %s3797_s27, [#allocation14]  }
0x112f   : > { %2939 = dma.done.wait (%p2571_p12), [#allocation5], 32  }
0x1130   : > { %2941 = vsyncadd (%p2571_p12), [#allocation5], 4294967264 }
0x1131   : > { %2943 = dma.done.wait (%p2571_p12), [#allocation14], 16  }
0x1132   : > { %2945 = vsyncadd (%p2571_p12), [#allocation14], 4294967280 }
0x1133 PF: > { %s3798_s25 = sld [smem:[#allocation21_spill]]  ;;  %s3799_s6 = sld [smem:[#allocation20_spill]] }
0x1134   : > { %s3800_s24 = sld [smem:[#allocation22_spill]]  ;;  %s3801_s4 = smov %s2952_s30 }
0x1139   : > { %p38_p7 = scmp.ge.s32.totalorder %s3798_s25, 4   ;;  %s3802_s30 = smov %s3799_s6 }
0x113b   :  { %40 = sbr.rel (!%p38_p7) target bundleno = 30 (0x1e), region = 215 }
0x1142   :  { %2093 = vsyncpa [#allocation4], 1 }
0x1143   :  { %2095 = vsyncpa [#allocation4 + $0x1], 1 }
0x1144   :  { %2096 = vsyncpa [#allocation7], 1 }
0x1145   :  { %2097 = vsyncpa [#allocation10], 1 }
0x1146   :  { %2099 = vsyncpa [#allocation10 + $0x1], 1 }
0x1147   :  { %2100 = vsyncpa [#allocation5], 1 }
0x1148   :  { %2102 = vsyncpa [#allocation5 + $0x1], 1 }
0x1149   :  { %2103 = vsyncpa [#allocation14], 1 }

</bundles_post_ra>
